<compile_context>
chip_gen: v5e
topology: v5e:2x2
jax: 0.10.0
libtpu: 0.0.40
codegen_flags: <defaults>
</compile_context>

<pallas_src>
import functools

import jax
import jax.numpy as jnp
from jax.experimental import pallas as pl
from jax.experimental.pallas import tpu as pltpu


def _upconv_bn_relu_kernel(x_ref, w_ref, shift_ref, o_ref, col_ref, *, TH, W, Cin, Cout):
    # x_ref:     (1, H+2, W+2, Cin)  zero-padded ORIGINAL-resolution input (bf16), one batch elem
    # w_ref:     (9*Cin, 4*Cout)     parity-folded, BN-scale-folded conv weights (bf16)
    # shift_ref: (1, 4*Cout)         folded BN shift, tiled over the 4 output parities (f32)
    # o_ref:     (TH*W, 4*Cout)      output row tile, lane dim = (a, b, co) (f32)
    # col_ref:   (TH, W, 9*Cin)      VMEM im2col scratch (bf16)
    r = pl.program_id(1)
    r0 = pl.multiple_of(r * TH, TH)

    # Halo'd row band of the padded original image for this output row tile.
    xt = x_ref[0, pl.ds(r0, TH + 2), :, :]                      # (TH+2, W+2, Cin)

    # Build the im2col buffer once; columns ordered (s, t, ci) to match w_ref rows.
    for s in range(3):
        for t in range(3):
            k = 3 * s + t
            col_ref[:, :, k * Cin:(k + 1) * Cin] = xt[s:s + TH, t:t + W, :]

    # Single MXU matmul: K = 9*Cin, bf16 operands, f32 accumulation.
    acc = jnp.dot(col_ref[...].reshape(TH * W, 9 * Cin), w_ref[...],
                  preferred_element_type=jnp.float32)           # (TH*W, 4*Cout)

    # Folded-BN shift + ReLU epilogue, lane-dense store.
    o_ref[...] = jnp.maximum(acc + shift_ref[0], 0.0).astype(o_ref.dtype)


def unet_up_forward(x_nchw, skip_nchw, weight_oihw, gamma, beta, run_mean, run_var, eps=0.8):
    """UNetUp forward. x_nchw: (N, Cin, H, W), skip_nchw: (N, Cs, 2H, 2W).
    Returns (N, Cout + Cs, 2H, 2W) in NCHW, matching the PyTorch module (eval-mode BN)."""
    N, Cin, H, W = x_nchw.shape
    Cout = weight_oihw.shape[0]
    Ho, Wo = 2 * H, 2 * W

    # Row-tile height for the spatial grid axis (bounds VMEM live ranges for large shapes).
    TH = 8 if H % 8 == 0 else H
    R = H // TH

    # ---- glue (plain JAX, original resolution only): layout + 1-px pad + bf16 cast ----
    x = jnp.transpose(x_nchw, (0, 2, 3, 1))
    xp = jnp.pad(x, ((0, 0), (1, 1), (1, 1), (0, 0))).astype(jnp.bfloat16)   # (N, H+2, W+2, Cin)

    # ---- fold BatchNorm (eval) and the nearest-x2 upsample into the conv weights ----
    scale = gamma / jnp.sqrt(run_var + eps)                                  # (Cout,)
    shift = beta - run_mean * scale                                          # (Cout,)
    w = jnp.transpose(weight_oihw, (2, 3, 1, 0)).astype(jnp.float32) * scale # HWIO, BN-scaled
    # fold[a, s, ky]: maps the 3 upsampled-grid taps (ky) onto the 3 original-grid taps (s)
    # for output parity a; same matrix is used for rows (a) and columns (b).
    fold = jnp.array([[[1., 0., 0.], [0., 1., 1.], [0., 0., 0.]],
                      [[0., 0., 0.], [1., 1., 0.], [0., 0., 1.]]], dtype=jnp.float32)
    wbig = jnp.einsum('ask,btl,klio->stiabo', fold, fold, w)                 # (3,3,Cin,2,2,Cout)
    wbig = wbig.reshape(9 * Cin, 4 * Cout).astype(jnp.bfloat16)
    shift4 = jnp.tile(shift, 4).reshape(1, 4 * Cout).astype(jnp.float32)

    # ---- hot path: Pallas kernel over (batch, row tiles) ----
    kern = functools.partial(_upconv_bn_relu_kernel, TH=TH, W=W, Cin=Cin, Cout=Cout)
    flops = 2 * N * H * W * (9 * Cin) * (4 * Cout)
    bytes_accessed = int(xp.size * 2 + wbig.size * 2 + shift4.size * 4 + N * H * W * 4 * Cout * 4)

    y = pl.pallas_call(
        kern,
        out_shape=jax.ShapeDtypeStruct((N * H * W, 4 * Cout), jnp.float32),
        grid_spec=pltpu.PrefetchScalarGridSpec(
            num_scalar_prefetch=0,
            grid=(N, R),
            in_specs=[
                # Full padded image per batch element; block index constant in r, so the
                # copy is skipped across consecutive row tiles of the same batch element.
                pl.BlockSpec((1, H + 2, W + 2, Cin), lambda n, r: (n, 0, 0, 0)),
                pl.BlockSpec((9 * Cin, 4 * Cout), lambda n, r: (0, 0)),
                pl.BlockSpec((1, 4 * Cout), lambda n, r: (0, 0)),
            ],
            # 2-D, lane-denser output block: last dim = 4*Cout (all four parities).
            out_specs=pl.BlockSpec((TH * W, 4 * Cout), lambda n, r: (n * R + r, 0)),
            scratch_shapes=[pltpu.VMEM((TH, W, 9 * Cin), jnp.bfloat16)],
        ),
        compiler_params=pltpu.CompilerParams(
            dimension_semantics=("parallel", "parallel")),
        cost_estimate=pl.CostEstimate(flops=flops, transcendentals=0,
                                      bytes_accessed=bytes_accessed),
    )(xp, wbig, shift4)

    # ---- glue: un-interleave the 4 parities -> NCHW, concat with skip ----
    y = y.reshape(N, H, W, 2, 2, Cout)             # (n, i, j, a, b, co)
    y = jnp.transpose(y, (0, 5, 1, 3, 2, 4))       # (n, co, i, a, j, b)
    y = y.reshape(N, Cout, Ho, Wo)                 # out[n, co, 2i+a, 2j+b]
    return jnp.concatenate([y, skip_nchw.astype(y.dtype)], axis=1)


def _reference_forward(x_nchw, skip_nchw, weight_oihw, gamma, beta, run_mean, run_var, eps=0.8):
    """Pure-JAX reference (upsample + lax.conv + BN + ReLU + concat)."""
    x = jnp.transpose(x_nchw, (0, 2, 3, 1)).astype(jnp.float32)
    x = jnp.repeat(jnp.repeat(x, 2, axis=1), 2, axis=2)          # nearest x2
    x = x.astype(jnp.bfloat16).astype(jnp.float32)               # mirror kernel's bf16 activations
    w = jnp.transpose(weight_oihw, (2, 3, 1, 0)).astype(jnp.float32)
    y = jax.lax.conv_general_dilated(x, w, (1, 1), "SAME",
                                     dimension_numbers=("NHWC", "HWIO", "NHWC"))
    scale = gamma / jnp.sqrt(run_var + eps)
    y = y * scale + (beta - run_mean * scale)
    y = jnp.maximum(y, 0.0)
    y = jnp.transpose(y, (0, 3, 1, 2))
    return jnp.concatenate([y, skip_nchw.astype(y.dtype)], axis=1)


if __name__ == "__main__":
    # Small shapes: in_size=4, out_size=8, batch=2, spatial 16x16 (upsampled to 32x32).
    N, Cin, Cout, H, W = 2, 4, 8, 16, 16

    key = jax.random.PRNGKey(0)
    kx, ks, kw, kg, kb, km, kv = jax.random.split(key, 7)

    x = jax.random.normal(kx, (N, Cin, H, W), dtype=jnp.float32)              # module input (NCHW)
    skip = jax.random.normal(ks, (N, Cout, 2 * H, 2 * W), dtype=jnp.float32)  # skip connection

    # Synthetic parameters (Conv2d weight OIHW, BatchNorm2d affine + running stats).
    weight = 0.1 * jax.random.normal(kw, (Cout, Cin, 3, 3), dtype=jnp.float32)
    gamma = 1.0 + 0.1 * jax.random.normal(kg, (Cout,), dtype=jnp.float32)
    beta = 0.1 * jax.random.normal(kb, (Cout,), dtype=jnp.float32)
    run_mean = 0.1 * jax.random.normal(km, (Cout,), dtype=jnp.float32)
    run_var = jnp.abs(jax.random.normal(kv, (Cout,), dtype=jnp.float32)) + 0.5

    fwd = jax.jit(unet_up_forward)
    out = jax.block_until_ready(fwd(x, skip, weight, gamma, beta, run_mean, run_var))

    ref = _reference_forward(x, skip, weight, gamma, beta, run_mean, run_var)
    assert out.shape == (N, 2 * Cout, 2 * H, 2 * W), out.shape
    max_err = float(jnp.max(jnp.abs(out - ref)))
    assert jnp.allclose(out, ref, atol=3e-2, rtol=3e-2), max_err

    print("KERNEL_OK")
</pallas_src>

<mosaic_0001>
module attributes {stable_mosaic.version = 11 : i64} {
  func.func @_upconv_bn_relu_kernel(%arg0: i32, %arg1: i32, %arg2: memref<1x18x18x4xbf16, #tpu.memory_space<vmem>>, %arg3: memref<36x32xbf16, #tpu.memory_space<vmem>>, %arg4: memref<1x32xf32, #tpu.memory_space<vmem>>, %arg5: memref<128x32xf32, #tpu.memory_space<vmem>>, %arg6: memref<8x16x36xbf16, #tpu.memory_space<vmem>>) attributes {dimension_semantics = [#tpu.dimension_semantics<parallel>, #tpu.dimension_semantics<parallel>], iteration_bounds = array<i64: 2, 2>, scalar_prefetch = 0 : i64, scratch_operands = 1 : i64, tpu.core_type = #tpu.core_type<tc>, window_params = [{transform_indices = @transform_0, window_bounds = array<i64: 1, 18, 18, 4>}, {pipeline_mode = #tpu.pipeline_mode<synchronous>, transform_indices = @transform_1, window_bounds = array<i64: 36, 32>}, {pipeline_mode = #tpu.pipeline_mode<synchronous>, transform_indices = @transform_2, window_bounds = array<i64: 1, 32>}, {transform_indices = @transform_3, window_bounds = array<i64: 128, 32>}]} {
    %c8_i32 = arith.constant 8 : i32
    %0 = arith.muli %arg1, %c8_i32 : i32
    %1 = tpu.assume_multiple %0, 8 : i32
    %c0 = arith.constant 0 : index
    %2 = arith.index_cast %1 : i32 to index
    %c0_0 = arith.constant 0 : index
    %c0_1 = arith.constant 0 : index
    %3 = vector.load %arg2[%c0, %2, %c0_0, %c0_1] : memref<1x18x18x4xbf16, #tpu.memory_space<vmem>>, vector<1x10x18x4xbf16>
    %4 = vector.shape_cast %3 : vector<1x10x18x4xbf16> to vector<10x18x4xbf16>
    %5 = vector.extract_strided_slice %4 {offsets = [0, 0, 0], sizes = [8, 16, 4], strides = [1, 1, 1]} : vector<10x18x4xbf16> to vector<8x16x4xbf16>
    %c0_2 = arith.constant 0 : index
    %c0_3 = arith.constant 0 : index
    %c0_4 = arith.constant 0 : index
    %6 = vector.load %arg6[%c0_2, %c0_3, %c0_4] : memref<8x16x36xbf16, #tpu.memory_space<vmem>>, vector<8x16x4xbf16>
    tpu.vector_store %arg6[%c0_2, %c0_3, %c0_4], %5 {strides = array<i32>} : memref<8x16x36xbf16, #tpu.memory_space<vmem>>, vector<8x16x4xbf16>,
    %7 = vector.extract_strided_slice %4 {offsets = [0, 1, 0], sizes = [8, 16, 4], strides = [1, 1, 1]} : vector<10x18x4xbf16> to vector<8x16x4xbf16>
    %c0_5 = arith.constant 0 : index
    %c0_6 = arith.constant 0 : index
    %c4 = arith.constant 4 : index
    %8 = vector.load %arg6[%c0_5, %c0_6, %c4] : memref<8x16x36xbf16, #tpu.memory_space<vmem>>, vector<8x16x4xbf16>
    tpu.vector_store %arg6[%c0_5, %c0_6, %c4], %7 {strides = array<i32>} : memref<8x16x36xbf16, #tpu.memory_space<vmem>>, vector<8x16x4xbf16>,
    %9 = vector.extract_strided_slice %4 {offsets = [0, 2, 0], sizes = [8, 16, 4], strides = [1, 1, 1]} : vector<10x18x4xbf16> to vector<8x16x4xbf16>
    %c0_7 = arith.constant 0 : index
    %c0_8 = arith.constant 0 : index
    %c8 = arith.constant 8 : index
    %10 = vector.load %arg6[%c0_7, %c0_8, %c8] : memref<8x16x36xbf16, #tpu.memory_space<vmem>>, vector<8x16x4xbf16>
    tpu.vector_store %arg6[%c0_7, %c0_8, %c8], %9 {strides = array<i32>} : memref<8x16x36xbf16, #tpu.memory_space<vmem>>, vector<8x16x4xbf16>,
    %11 = vector.extract_strided_slice %4 {offsets = [1, 0, 0], sizes = [8, 16, 4], strides = [1, 1, 1]} : vector<10x18x4xbf16> to vector<8x16x4xbf16>
    %c0_9 = arith.constant 0 : index
    %c0_10 = arith.constant 0 : index
    %c12 = arith.constant 12 : index
    %12 = vector.load %arg6[%c0_9, %c0_10, %c12] : memref<8x16x36xbf16, #tpu.memory_space<vmem>>, vector<8x16x4xbf16>
    tpu.vector_store %arg6[%c0_9, %c0_10, %c12], %11 {strides = array<i32>} : memref<8x16x36xbf16, #tpu.memory_space<vmem>>, vector<8x16x4xbf16>,
    %13 = vector.extract_strided_slice %4 {offsets = [1, 1, 0], sizes = [8, 16, 4], strides = [1, 1, 1]} : vector<10x18x4xbf16> to vector<8x16x4xbf16>
    %c0_11 = arith.constant 0 : index
    %c0_12 = arith.constant 0 : index
    %c16 = arith.constant 16 : index
    %14 = vector.load %arg6[%c0_11, %c0_12, %c16] : memref<8x16x36xbf16, #tpu.memory_space<vmem>>, vector<8x16x4xbf16>
    tpu.vector_store %arg6[%c0_11, %c0_12, %c16], %13 {strides = array<i32>} : memref<8x16x36xbf16, #tpu.memory_space<vmem>>, vector<8x16x4xbf16>,
    %15 = vector.extract_strided_slice %4 {offsets = [1, 2, 0], sizes = [8, 16, 4], strides = [1, 1, 1]} : vector<10x18x4xbf16> to vector<8x16x4xbf16>
    %c0_13 = arith.constant 0 : index
    %c0_14 = arith.constant 0 : index
    %c20 = arith.constant 20 : index
    %16 = vector.load %arg6[%c0_13, %c0_14, %c20] : memref<8x16x36xbf16, #tpu.memory_space<vmem>>, vector<8x16x4xbf16>
    tpu.vector_store %arg6[%c0_13, %c0_14, %c20], %15 {strides = array<i32>} : memref<8x16x36xbf16, #tpu.memory_space<vmem>>, vector<8x16x4xbf16>,
    %17 = vector.extract_strided_slice %4 {offsets = [2, 0, 0], sizes = [8, 16, 4], strides = [1, 1, 1]} : vector<10x18x4xbf16> to vector<8x16x4xbf16>
    %c0_15 = arith.constant 0 : index
    %c0_16 = arith.constant 0 : index
    %c24 = arith.constant 24 : index
    %18 = vector.load %arg6[%c0_15, %c0_16, %c24] : memref<8x16x36xbf16, #tpu.memory_space<vmem>>, vector<8x16x4xbf16>
    tpu.vector_store %arg6[%c0_15, %c0_16, %c24], %17 {strides = array<i32>} : memref<8x16x36xbf16, #tpu.memory_space<vmem>>, vector<8x16x4xbf16>,
    %19 = vector.extract_strided_slice %4 {offsets = [2, 1, 0], sizes = [8, 16, 4], strides = [1, 1, 1]} : vector<10x18x4xbf16> to vector<8x16x4xbf16>
    %c0_17 = arith.constant 0 : index
    %c0_18 = arith.constant 0 : index
    %c28 = arith.constant 28 : index
    %20 = vector.load %arg6[%c0_17, %c0_18, %c28] : memref<8x16x36xbf16, #tpu.memory_space<vmem>>, vector<8x16x4xbf16>
    tpu.vector_store %arg6[%c0_17, %c0_18, %c28], %19 {strides = array<i32>} : memref<8x16x36xbf16, #tpu.memory_space<vmem>>, vector<8x16x4xbf16>,
    %21 = vector.extract_strided_slice %4 {offsets = [2, 2, 0], sizes = [8, 16, 4], strides = [1, 1, 1]} : vector<10x18x4xbf16> to vector<8x16x4xbf16>
    %c0_19 = arith.constant 0 : index
    %c0_20 = arith.constant 0 : index
    %c32 = arith.constant 32 : index
    %22 = vector.load %arg6[%c0_19, %c0_20, %c32] : memref<8x16x36xbf16, #tpu.memory_space<vmem>>, vector<8x16x4xbf16>
    tpu.vector_store %arg6[%c0_19, %c0_20, %c32], %21 {strides = array<i32>} : memref<8x16x36xbf16, #tpu.memory_space<vmem>>, vector<8x16x4xbf16>,
    %c0_21 = arith.constant 0 : index
    %c0_22 = arith.constant 0 : index
    %c0_23 = arith.constant 0 : index
    %23 = vector.load %arg6[%c0_21, %c0_22, %c0_23] : memref<8x16x36xbf16, #tpu.memory_space<vmem>>, vector<8x16x36xbf16>
    %24 = vector.shape_cast %23 : vector<8x16x36xbf16> to vector<128x36xbf16>
    %c0_24 = arith.constant 0 : index
    %c0_25 = arith.constant 0 : index
    %25 = vector.load %arg3[%c0_24, %c0_25] : memref<36x32xbf16, #tpu.memory_space<vmem>>, vector<36x32xbf16>
    %cst = arith.constant dense<0.000000e+00> : vector<128x32xf32>
    %26 = tpu.matmul %24, %25, %cst {dimension_numbers = #tpu.dot_dimension_numbers<[1], [0], [0], [1], [0, 0, 1, 1], [], []>} : vector<128x36xbf16>, vector<36x32xbf16>, vector<128x32xf32> -> vector<128x32xf32>
    %c0_26 = arith.constant 0 : index
    %c0_27 = arith.constant 0 : index
    %27 = vector.load %arg4[%c0_26, %c0_27] : memref<1x32xf32, #tpu.memory_space<vmem>>, vector<1x32xf32>
    %28 = vector.shape_cast %27 : vector<1x32xf32> to vector<32xf32>
    %29 = vector.shape_cast %28 : vector<32xf32> to vector<1x32xf32>
    %30 = vector.broadcast %29 : vector<1x32xf32> to vector<128x32xf32>
    %31 = arith.addf %26, %30 : vector<128x32xf32>
    %cst_28 = arith.constant 0.000000e+00 : f32
    %32 = vector.broadcast %cst_28 : f32 to vector<128x32xf32>
    %33 = arith.maximumf %31, %32 : vector<128x32xf32>
    %c0_29 = arith.constant 0 : index
    %c0_30 = arith.constant 0 : index
    %34 = vector.load %arg5[%c0_29, %c0_30] : memref<128x32xf32, #tpu.memory_space<vmem>>, vector<128x32xf32>
    tpu.vector_store %arg5[%c0_29, %c0_30], %33 {strides = array<i32>} : memref<128x32xf32, #tpu.memory_space<vmem>>, vector<128x32xf32>,
    return
  }
  func.func @transform_0(%arg0: i32, %arg1: i32) -> (i32, i32, i32, i32) {
    %c0_i32 = arith.constant 0 : i32
    %c0_i32_0 = arith.constant 0 : i32
    %c0_i32_1 = arith.constant 0 : i32
    %c0_i32_2 = arith.constant 0 : i32
    return %arg0, %c0_i32, %c0_i32_0, %c0_i32_1 : i32, i32, i32, i32
  }
  func.func @transform_1(%arg0: i32, %arg1: i32) -> (i32, i32) {
    %c0_i32 = arith.constant 0 : i32
    %c0_i32_0 = arith.constant 0 : i32
    %c0_i32_1 = arith.constant 0 : i32
    return %c0_i32, %c0_i32_0 : i32, i32
  }
  func.func @transform_2(%arg0: i32, %arg1: i32) -> (i32, i32) {
    %c0_i32 = arith.constant 0 : i32
    %c0_i32_0 = arith.constant 0 : i32
    %c0_i32_1 = arith.constant 0 : i32
    return %c0_i32, %c0_i32_0 : i32, i32
  }
  func.func @transform_3(%arg0: i32, %arg1: i32) -> (i32, i32) {
    %c2_i32 = arith.constant 2 : i32
    %0 = arith.muli %arg0, %c2_i32 : i32
    %1 = arith.addi %0, %arg1 : i32
    %c0_i32 = arith.constant 0 : i32
    %c0_i32_0 = arith.constant 0 : i32
    return %1, %c0_i32 : i32, i32
  }
}

</mosaic_0001>

<bundles_post_ra>
// kernel: tile.8
= control target key start
LH: loop header
LB: loop body
LE: loop exit
PB: predicated region body
PF: predicated region fallthrough
CT: control target
= control target key end

     0   :  { %s22_s0 = inlined_call_operand.vmem [shape: f32[8], index: 0, kind: input, shape index: {}]   ;;  %s23_s1 = inlined_call_operand.vmem [shape: f32[4,8], index: 1, kind: output, shape index: {}]  }
   0x1   :  { %v4_v0 = vld [vmem:[%s22_s0] ss:$0 sm:$0xff] }
   0x2   :  { %5 = vst [vmem:[%s23_s1] sm:$0xf] %v4_v0 }

// kernel: tile.9
= control target key start
LH: loop header
LB: loop body
LE: loop exit
PB: predicated region body
PF: predicated region fallthrough
CT: control target
= control target key end

     0   :  { %s37_s8 = smov 8   ;;  %s38_s9 = smov 16   ;;  %vm7_vm0 = vcmask 64512   ;;  %vm13_vm1 = vcmask 261312   ;;  %vm19_vm2 = vcmask 195712   ;;  %vm25_vm3 = vcmask 130112   ;;  %s55_s0 = inlined_call_operand.vmem [shape: f32[4,8], index: 0, kind: input, shape index: {}]   ;;  %s56_s1 = inlined_call_operand.vmem [shape: f32[1,32], index: 1, kind: output, shape index: {}]  }
   0x1   :  { %v4_v0 = vld [vmem:[%s55_s0] sm:$0xf]  ;;  %s36_s0 = smov 24  }
   0x2   :  { %5 = vst [vmem:[#allocation1] sm:$0xf] %v4_v0 }
   0x9   :  { %v10_v1 = vld [vmem:[#allocation1 + $0x3] sm:$0x1]   ;;  %v22_v2 = vld [vmem:[#allocation1 + $0x1] sm:$0x1]   ;;  %v16_v3 = vld [vmem:[#allocation1 + $0x2] sm:$0x1]  }
   0xa   :  { %11 = vrot.lane.b32.xlu0 %v10_v1, %s36_s0  ;;  %23 = vrot.lane.b32.xlu1 %v22_v2, %s37_s8  ;;  %v6_v4 = vld [vmem:[#allocation1] sm:$0x1]  }
   0xb   :  { %8 = vst.msk [vmem:[#allocation0] sm:$0x1] %vm7_vm0, %v6_v4  }
  0x12   :  { %17 = vrot.lane.b32.xlu0 %v16_v3, %s38_s9 }
  0x7c   :  { %v12_v5 = vpop.permute.xlu0 %11   ;;  %v24_v6 = vpop.permute.xlu1 %23  }
  0x7d   :  { %14 = vst.msk [vmem:[#allocation0] sm:$0x1] %vm13_vm1, %v12_v5  }
  0x84   :  { %v18_v7 = vpop.permute.xlu0 %17  }
  0x85   :  { %20 = vst.msk [vmem:[#allocation0] sm:$0x1] %vm19_vm2, %v18_v7  }
  0x86   :  { %26 = vst.msk [vmem:[#allocation0] sm:$0x1] %vm25_vm3, %v24_v6  }
  0x8d   :  { %v29_v8 = vld [vmem:[#allocation0] sm:$0x1] }
  0x8e   :  { %32 = vst [vmem:[%s56_s1] sm:$0x1] %v29_v8 }

// kernel: unet_up_forward.1
= control target key start
LH: loop header
LB: loop body
LE: loop exit
PB: predicated region body
PF: predicated region fallthrough
CT: control target
= control target key end

     0   :  { %s1591_s12 = smov 0   ;;  %s1593_s13 = smov 0   ;;  %s2453_s0 = inlined_call_operand.vmem [shape: bf16[2,18,18,4], index: 0, kind: input, shape index: {}]   ;;  %s2454_s1 = inlined_call_operand.vmem [shape: bf16[36,32], index: 1, kind: input, shape index: {}]   ;;  %s2455_s2 = inlined_call_operand.vmem [shape: f32[1,32], index: 2, kind: input, shape index: {}]   ;;  %s2456_s3 = inlined_call_operand.vmem [shape: f32[512,32], index: 3, kind: output, shape index: {}]  }
   0x1   :  { %s1595_s14 = smov 0   ;;  %s1597_s15 = smov 0  }
   0x2   :  { %s1599_s16 = smov 0  }
   0x3 LB: > { %s22_s17 = sadd.s32 1, %s1553_s14  ;;  %s25_s18 = sadd.s32 1, %s1557_s15  ;;  %s1561_s16 = sphi %s1599_s16, %s13_s16   ;;  %s1557_s15 = sphi %s1597_s15, %s2464_s15   ;;  %s1553_s14 = sphi %s1595_s14, %s2463_s14   ;;  %s1549_s13 = sphi %s1593_s13, %s2462_s13   ;;  %s1545_s12 = sphi %s1591_s12, %s2461_s12  }
   0x4   : > { %p23_p0 = scmp.ge.s32.totalorder %s22_s17, 2  ;;  %p1385_p1 = scmp.ge.s32.totalorder %s1561_s16, 1 }
   0x5   : > { %p153_p2 = scmp.lt.s32.totalorder %s1561_s16, 5 }
   0x6   : > { %s2466_s17 = smov (%p23_p0, %s22_s17), 0  ;;  %s2468_s18 = smov (!%p23_p0, %s25_s18), %s1557_s15 }
   0x7   : > { %p154_p3 = pnand %p1385_p1, %p153_p2  ;;  %p27_p4 = scmp.ge.s32.totalorder %s2468_s18, 2 }
   0x8   : > { %p179_p5 = scmp.lt.s32.totalorder (!%p154_p3), %s1549_s13, 1  ;;  %s1453_s20 = smul.u32 (!%p154_p3), 96, %s1545_s12 }
   0x9   : > { %s2470_s18 = smov (%p27_p4, %s2468_s18), 0  ;;  %157 = sbr.rel (%p154_p3) target bundleno = 629 (0x275), region = 32 }
   0xa   : > { %s1563_s26 = smov (!%p154_p3), 4   ;;  %s1564_s27 = smov (!%p154_p3), 8  }
   0xb   : > { %s1565_s28 = smov (!%p154_p3), 12   ;;  %s1566_s29 = smov (!%p154_p3), 16  }
   0xc   : > { %s1567_s30 = smov (!%p154_p3), 20   ;;  %s1568_s4 = smov (!%p154_p3), 24  }
   0xd   : > { %s1569_s5 = smov (!%p154_p3), 28   ;;  %s1570_s6 = smov (!%p154_p3), 32  }
   0xe   : > { %s180_s19 = scalar_select %p179_p5, %s1549_s13, 1  ;;  %vm246_vm0 = vsmask.f32 3328  ;;  %vm247_vm1 = vsmask.f32 7440  ;;  %vm530_vm3 = vcmask 1042432  }
   0xf   : > { %vm1666_vm2 = vmor %vm246_vm0, %vm247_vm1  ;;  %vm531_vm4 = vcmask 1046532   ;;  %vm229_vm6 = vcmask 27648   ;;  %vm489_vm7 = vcmask 60448   ;;  %vm637_vm8 = vcmask 93248  }
  0x10   : > { %s1473_s21 = smul.u32 216, %s180_s19  ;;  %vm1833_vm5 = vmor %vm530_vm3, %vm531_vm4  ;;  %vm704_vm9 = vcmask 126048   ;;  %vm793_vm10 = vcmask 158848   ;;  %vm866_vm11 = vcmask 191648   ;;  %vm1217_vm12 = vcmask 1041408  }
  0x11   : > { %vm933_vm13 = vcmask 224448   ;;  %vm1022_vm14 = vcmask 257248   ;;  %vm1095_vm15 = vcmask 290048   ;;  %vm1192_vm0 = vcmask 293888  }
  0x12   : > { %s183_s24 = scalar_lea.vmem %s2453_s0, %s1473_s21  ;;  %vm1286_vm1 = vcmask 261120  }
  0x13   : > { %s1631_s25 = scalar_lea.vmem %s183_s24, %s1453_s20  ;;  %s1387_s20 = sshll.u32 %s1549_s13, 1 }
  0x14   : > { %v1634_v0 = vld [vmem:[%s1631_s25 + $0xc] sm:$0xf]  ;;  %v1637_v1 = vld [vmem:[%s1631_s25 + $0x10] sm:$0xf]  ;;  %v1640_v2 = vld [vmem:[%s1631_s25] sm:$0xf]  ;;  %s185_s21 = sadd.s32 %s1545_s12, %s1387_s20 }
  0x15   : > { %v274_v3 = vshrl.u32 %v1634_v0, 16  ;;  %v277_v4 = vshll.u32 %v1634_v0, 16  ;;  %v283_v5 = vshll.u32 %v1637_v1, 16  ;;  %v1646_v6 = vld [vmem:[%s1631_s25 + $0x4] sm:$0xf]  ;;  %v250_v7 = vshrl.u32 %v1640_v2, 16 }
  0x16   : > { %v253_v8 = vshll.u32 %v1640_v2, 16  ;;  %v259_v9 = vshll.u32 %v1646_v6, 16  ;;  %v1652_v10 = vld [vmem:[%s1631_s25 + $0x14] sm:$0x1]  ;;  %v287_v11 = vshrl.u32 %v1637_v1, 16  ;;  %v263_v12 = vshrl.u32 %v1646_v6, 16 }
  0x17   : > { %v276_v13 = vrot.slane %v274_v3, 4  ;;  %v279_v14 = vrot.slane %v277_v4, 5  ;;  %v252_v15 = vrot.slane %v250_v7, 4  ;;  %v1657_v16 = vld [vmem:[%s1631_s25 + $0x8] sm:$0x1]  ;;  %v285_v17 = vrot.slane %v283_v5, 5 }
  0x18   : > { %v255_v18 = vrot.slane %v253_v8, 5  ;;  %v261_v19 = vrot.slane %v259_v9, 5  ;;  %v289_v20 = vrot.slane %v287_v11, 4  ;;  %v1660_v21 = vld [vmem:[%s1631_s25 + $0x28] sm:$0xf]  ;;  %v293_v23 = vshll.u32 %v1652_v10, 16 }
  0x19   : > { %v280_v22 = vor.u32 %v279_v14, %v276_v13  ;;  %v265_v24 = vrot.slane %v263_v12, 4  ;;  %v331_v25 = vshll.u32 %v1660_v21, 16  ;;  %v269_v29 = vshll.u32 %v1657_v16, 16  ;;  %v1673_v31 = vld [vmem:[%s1631_s25 + $0x24] sm:$0xf]  ;;  %s1388_s22 = sshll.u32 %s185_s21, 4 }
  0x1a   : > { %v256_v27 = vor.u32 %v255_v18, %v252_v15  ;;  %v290_v28 = vor.u32 %v289_v20, %v285_v17  ;;  %v335_v30 = vshrl.u32 %v1660_v21, 16  ;;  %v1676_v35 = vld [vmem:[%s1631_s25 + $0x2c] sm:$0x1]  ;;  %v1681_v37 = vld [vmem:[%s1631_s25 + $0x18] sm:$0xf]  ;;  %v322_v40 = vshrl.u32 %v1673_v31, 16 }
  0x1b   : > { %v281_v32 = vrot.slane %v280_v22, 4  ;;  %v266_v33 = vor.u32 %v265_v24, %v261_v19  ;;  %v1678_v36 = vrot.slane %v331_v25, 5  ;;  %v325_v41 = vshll.u32 %v1673_v31, 16  ;;  %v1690_v42 = vld [vmem:[%s1631_s25 + $0x1c] sm:$0xf]  ;;  %p187_p6 = scmp.lt.s32.totalorder %s1388_s22, 63 }
  0x1c   : > { %v257_v34 = vrot.slane %v256_v27, 4  ;;  %v337_v39 = vrot.slane %v335_v30, 4  ;;  %v291_v44 = vrot.slane %v290_v28, 4  ;;  %v295_v45 = vrot.slane %v293_v23, 5  ;;  %v1697_v47 = vld [vmem:[%s1631_s25 + $0x3c] sm:$0xf] }
  0x1d   : > { %v1685_v38 = vsel %vm1666_vm2, %v281_v32, %v285_v17  ;;  %v271_v46 = vrot.slane %v269_v29, 5  ;;  %v267_v48 = vrot.slane %v266_v33, 4  ;;  %v324_v49 = vrot.slane %v322_v40, 4  ;;  %v1707_v58 = vld [vmem:[%s1631_s25 + $0x34] sm:$0xf]  ;;  %s2472_s22 = smov (!%p187_p6, %s1388_s22), 63 }
  0x1e   : > { %445 = vrot.lane.b32.xlu1 %v1685_v38, %s1563_s26  ;;  %v262_v43 = vsel %vm1666_vm2, %v257_v34, %v261_v19  ;;  %v327_v50 = vrot.slane %v325_v41, 5  ;;  %v298_v51 = vshrl.u32 %v1681_v37, 16  ;;  %v301_v52 = vshll.u32 %v1681_v37, 16  ;;  %v1717_v4 = vld [vmem:[%s1631_s25 + $0x20] sm:$0x1]  ;;  %s1389_s23 = sshll.u32 %s2472_s22, 3 }
  0x1f   : > { %441 = vrot.lane.b32.xlu0 %v262_v43, %s1563_s26  ;;  %v307_v53 = vshll.u32 %v1690_v42, 16  ;;  %v338_v54 = vor.u32 %v337_v39, %v1678_v36  ;;  %v341_v55 = vshll.u32 %v1676_v35, 16  ;;  %v370_v57 = vshrl.u32 %v1697_v47, 16  ;;  %v1725_v15 = vld [vmem:[%s1631_s25 + $0x40] sm:$0xf] }
  0x20   : > { %v300_v56 = vrot.slane %v298_v51, 4  ;;  %v303_v59 = vrot.slane %v301_v52, 5  ;;  %v373_v60 = vshll.u32 %v1697_v47, 16  ;;  %v1712_v61 = vsel %vm1666_vm2, %v291_v44, %v295_v45  ;;  %v1730_v22 = vld [vmem:[%s1631_s25 + $0x38] sm:$0x1] }
  0x21   : > { %v272_v62 = vsel %vm1666_vm2, %v267_v48, %v271_v46  ;;  %v328_v63 = vor.u32 %v327_v50, %v324_v49  ;;  %v309_v3 = vrot.slane %v307_v53, 5  ;;  %v355_v7 = vshll.u32 %v1707_v58, 16  ;;  %v1737_v28 = vld [vmem:[%s1631_s25 + $0x4c] sm:$0xf]  ;;  %v1740_v29 = vld [vmem:[%s1631_s25 + $0x30] sm:$0xf] }
  0x22   : > { %v304_v5 = vor.u32 %v303_v59, %v300_v56  ;;  %v359_v8 = vshrl.u32 %v1707_v58, 16  ;;  %v311_v9 = vshrl.u32 %v1690_v42, 16  ;;  %v339_v11 = vrot.slane %v338_v54, 4  ;;  %v1750_v33 = vld [vmem:[%s1631_s25 + $0x48] sm:$0xf] }
  0x23   : > { %v343_v12 = vrot.slane %v341_v55, 5  ;;  %v372_v13 = vrot.slane %v370_v57, 4  ;;  %v375_v17 = vrot.slane %v373_v60, 5  ;;  %v317_v19 = vshll.u32 %v1717_v4, 16  ;;  %234 = vst.msk [vmem:[#allocation2 + $0x10] sm:$0xf] %vm229_vm6, %v1681_v37 }
  0x24   : > { %v305_v14 = vrot.slane %v304_v5, 4  ;;  %v313_v18 = vrot.slane %v311_v9, 4  ;;  %v329_v20 = vrot.slane %v328_v63, 4  ;;  %v357_v24 = vrot.slane %v355_v7, 5  ;;  %v1773_v63 = vld [vmem:[%s1631_s25 + $0x50] sm:$0x1] }
  0x25   : > { %v361_v25 = vrot.slane %v359_v8, 4  ;;  %v1744_v30 = vsel %vm1666_vm2, %v339_v11, %v343_v12  ;;  %v379_v32 = vshll.u32 %v1725_v15, 16  ;;  %v376_v34 = vor.u32 %v375_v17, %v372_v13  ;;  %v1779_v8 = vld [vmem:[%s1631_s25 + $0x58] sm:$0xf]  ;;  %v1782_v11 = vld [vmem:[%s1631_s25 + $0x44] sm:$0x1] }
  0x26   : > { %447 = vrot.lane.b32.xlu1 %v1712_v61, %s1563_s26  ;;  %v1734_v23 = vsel %vm1666_vm2, %v305_v14, %v309_v3  ;;  %v314_v27 = vor.u32 %v313_v18, %v309_v3  ;;  %v365_v39 = vshll.u32 %v1730_v22, 16  ;;  %v319_v41 = vrot.slane %v317_v19, 5  ;;  %v1790_v18 = vld [vmem:[%s1631_s25 + $0x54] sm:$0xf]  ;;  %230 = vst.msk [vmem:[#allocation2] sm:$0xf] %vm229_vm6, %v1640_v2 }
  0x27   : > { %443 = vrot.lane.b32.xlu0 %v272_v62, %s1563_s26  ;;  %449 = vrot.lane.b32.xlu2 %v1734_v23, %s1563_s26  ;;  %v403_v43 = vshll.u32 %v1737_v28, 16  ;;  %v407_v44 = vshrl.u32 %v1737_v28, 16  ;;  %v346_v45 = vshrl.u32 %v1740_v29, 16  ;;  %v349_v46 = vshll.u32 %v1740_v29, 16  ;;  %231 = vst.msk [vmem:[#allocation2 + $0x4] sm:$0xf] %vm229_vm6, %v1646_v6 }
  0x28   : > { %v315_v40 = vrot.slane %v314_v27, 4  ;;  %v1760_v48 = vsel %vm1666_vm2, %v329_v20, %v1678_v36  ;;  %v362_v49 = vor.u32 %v361_v25, %v357_v24  ;;  %v394_v50 = vshrl.u32 %v1750_v33, 16  ;;  %232 = vst.msk [vmem:[#allocation2 + $0x8] sm:$0xf] %vm229_vm6, %v1634_v0 }
  0x29   : > { %v397_v51 = vshll.u32 %v1750_v33, 16  ;;  %v348_v52 = vrot.slane %v346_v45, 4  ;;  %v351_v53 = vrot.slane %v349_v46, 5  ;;  %v381_v54 = vrot.slane %v379_v32, 5  ;;  %233 = vst.msk [vmem:[#allocation2 + $0xc] sm:$0xf] %vm229_vm6, %v1637_v1 }
  0x2a   : > { %v367_v55 = vrot.slane %v365_v39, 5  ;;  %v1768_v56 = vsel %vm1666_vm2, %v315_v40, %v319_v41  ;;  %v377_v36 = vrot.slane %v376_v34, 4  ;;  %v405_v57 = vrot.slane %v403_v43, 5  ;;  %235 = vst.msk [vmem:[#allocation2 + $0x14] sm:$0xf] %vm229_vm6, %v1690_v42 }
  0x2b   : > { %v409_v59 = vrot.slane %v407_v44, 4  ;;  %v352_v60 = vor.u32 %v351_v53, %v348_v52  ;;  %v363_v62 = vrot.slane %v362_v49, 4  ;;  %v396_v3 = vrot.slane %v394_v50, 4  ;;  %v1812_v50 = vld [vmem:[%s1631_s25 + $0x5c] sm:$0x1] }
  0x2c   : > { %v399_v5 = vrot.slane %v397_v51, 5  ;;  %v383_v7 = vshrl.u32 %v1725_v15, 16  ;;  %v1786_v13 = vsel %vm1666_vm2, %v377_v36, %v381_v54  ;;  %v413_v17 = vshll.u32 %v1773_v63, 16  ;;  %236 = vst.msk [vmem:[#allocation2 + $0x18] sm:$0xf] %vm229_vm6, %v1673_v31 }
  0x2d   : > { %v353_v9 = vrot.slane %v352_v60, 4  ;;  %v410_v14 = vor.u32 %v409_v59, %v405_v57  ;;  %v1794_v19 = vsel %vm1666_vm2, %v363_v62, %v367_v55  ;;  %v427_v25 = vshll.u32 %v1779_v8, 16  ;;  %237 = vst.msk [vmem:[#allocation2 + $0x1c] sm:$0xf] %vm229_vm6, %v1660_v21 }
  0x2e   : > { %455 = vrot.lane.b32.xlu1 %v1744_v30, %s1563_s26  ;;  %v385_v12 = vrot.slane %v383_v7, 4  ;;  %v400_v20 = vor.u32 %v399_v5, %v396_v3  ;;  %v431_v27 = vshrl.u32 %v1779_v8, 16  ;;  %v389_v32 = vshll.u32 %v1782_v11, 16  ;;  %238 = vst.msk [vmem:[#allocation2 + $0x20] sm:$0xf] %vm229_vm6, %v1740_v29 }
  0x2f   : > { %453 = vrot.lane.b32.xlu0 %v1760_v48, %s1563_s26  ;;  %451 = vrot.lane.b32.xlu2 %v1768_v56, %s1563_s26  ;;  %v1803_v34 = vsel %vm1666_vm2, %v353_v9, %v357_v24  ;;  %v418_v40 = vshrl.u32 %v1790_v18, 16  ;;  %v421_v41 = vshll.u32 %v1790_v18, 16  ;;  %v411_v43 = vrot.slane %v410_v14, 4  ;;  %239 = vst.msk [vmem:[#allocation2 + $0x24] sm:$0xf] %vm229_vm6, %v1707_v58 }
  0x30   : > { %v386_v39 = vor.u32 %v385_v12, %v381_v54  ;;  %v415_v44 = vrot.slane %v413_v17, 5  ;;  %v401_v45 = vrot.slane %v400_v20, 4  ;;  %v429_v46 = vrot.slane %v427_v25, 5  ;;  %240 = vst.msk [vmem:[#allocation2 + $0x28] sm:$0xf] %vm229_vm6, %v1697_v47 }
  0x31   : > { %v433_v49 = vrot.slane %v431_v27, 4  ;;  %v391_v51 = vrot.slane %v389_v32, 5  ;;  %v420_v52 = vrot.slane %v418_v40, 4  ;;  %v423_v53 = vrot.slane %v421_v41, 5  ;;  %241 = vst.msk [vmem:[#allocation2 + $0x2c] sm:$0xf] %vm229_vm6, %v1725_v15 }
  0x32   : > { %v387_v24 = vrot.slane %v386_v39, 4  ;;  %v1816_v54 = vsel %vm1666_vm2, %v411_v43, %v415_v44  ;;  %v1820_v55 = vsel %vm1666_vm2, %v401_v45, %v405_v57  ;;  %v437_v59 = vshll.u32 %v1812_v50, 16  ;;  %242 = vst.msk [vmem:[#allocation2 + $0x30] sm:$0xf] %vm229_vm6, %v1750_v33 }
  0x33   : > { %v434_v36 = vor.u32 %v433_v49, %v429_v46  ;;  %v424_v62 = vor.u32 %v423_v53, %v420_v52  ;;  %v1393_v3 = vrot.slane %v1640_v2, 9  ;;  %v535_v57 = vrot.slane %v1646_v6, 5  ;;  %243 = vst.msk [vmem:[#allocation2 + $0x34] sm:$0xf] %vm229_vm6, %v1737_v28 }
  0x34   : > { %v1827_v60 = vsel %vm1666_vm2, %v387_v24, %v391_v51  ;;  %v439_v9 = vrot.slane %v437_v59, 5  ;;  %v542_v17 = vrot.slane %v1637_v1, 5  ;;  %v545_v32 = vrot.slane %v1652_v10, 5  ;;  %244 = vst.msk [vmem:[#allocation2 + $0x38] sm:$0xf] %vm229_vm6, %v1790_v18 }
  0x35   : > { %v435_v7 = vrot.slane %v434_v36, 4  ;;  %v425_v12 = vrot.slane %v424_v62, 4  ;;  %v536_v14 = vsel %vm1833_vm5, %v1393_v3, %v535_v57  ;;  %v1394_v39 = vrot.slane %v1634_v0, 9  ;;  %245 = vst.msk [vmem:[#allocation2 + $0x3c] sm:$0xf] %vm229_vm6, %v1779_v8 }
  0x36   : > { %461 = vrot.lane.b32.xlu1 %v1786_v13, %s1563_s26  ;;  %v544_v27 = vrot.slane %v542_v17, 4  ;;  %v537_v40 = vrot.slane %v535_v57, 4  ;;  %v538_v41 = vrot.slane %v1657_v16, 5  ;;  %v549_v45 = vrot.slane %v1690_v42, 5 }
  0x37   : > { %459 = vrot.lane.b32.xlu0 %v1794_v19, %s1563_s26  ;;  %457 = vrot.lane.b32.xlu2 %v1803_v34, %s1563_s26  ;;  %v1844_v20 = vsel %vm1666_vm2, %v435_v7, %v439_v9  ;;  %v1849_v25 = vsel %vm1666_vm2, %v425_v12, %v429_v46  ;;  %v1864_v44 = vsel %vm1833_vm5, %v1394_v39, %v542_v17  ;;  %v1396_v16 = vrot.slane %v1673_v31, 9 }
  0x38   : > { %v1860_v43 = vsel %vm1833_vm5, %v544_v27, %v545_v32  ;;  %v539_v10 = vsel %vm1833_vm5, %v537_v40, %v538_v41  ;;  %v556_v46 = vrot.slane %v1660_v21, 5  ;;  %v551_v49 = vrot.slane %v549_v45, 4 }
  0x39   : > { %v552_v24 = vrot.slane %v1717_v4, 5  ;;  %v1395_v51 = vrot.slane %v1681_v37, 9  ;;  %v563_v53 = vrot.slane %v1707_v58, 5  ;;  %v566_v62 = vrot.slane %v1730_v22, 5 }
  0x3a   : > { %v1880_v52 = vsel %vm1833_vm5, %v1396_v16, %v556_v46  ;;  %v1397_v3 = vrot.slane %v1740_v29, 9  ;;  %v558_v57 = vrot.slane %v556_v46, 4  ;;  %v559_v7 = vrot.slane %v1676_v35, 5 }
  0x3b   : > { %v1885_v36 = vsel %vm1833_vm5, %v551_v49, %v552_v24  ;;  %v1891_v4 = vsel %vm1833_vm5, %v1395_v51, %v549_v45  ;;  %v565_v59 = vrot.slane %v563_v53, 4  ;;  %v1399_v35 = vrot.slane %v1750_v33, 9 }
  0x3c   : > { %v1906_v12 = vsel %vm1833_vm5, %v1397_v3, %v563_v53  ;;  %v1913_v22 = vsel %vm1833_vm5, %v558_v57, %v559_v7  ;;  %v577_v17 = vrot.slane %v1737_v28, 5  ;;  %v573_v32 = vrot.slane %v1782_v11, 5  ;;  %v2039_v7 = vld [vmem:[%s1631_s25 + $0x64] sm:$0xf] }
  0x3d   : > { %v1902_v9 = vsel %vm1833_vm5, %v565_v59, %v566_v62  ;;  %v1398_v39 = vrot.slane %v1697_v47, 9  ;;  %v584_v41 = vrot.slane %v1779_v8, 5  ;;  %v587_v16 = vrot.slane %v1812_v50, 5 }
  0x3e   : > { %467 = vrot.lane.b32.xlu1 %v1816_v54, %s1563_s26  ;;  %v1925_v40 = vsel %vm1833_vm5, %v1399_v35, %v577_v17  ;;  %v1400_v46 = vrot.slane %v1790_v18, 9  ;;  %v579_v49 = vrot.slane %v577_v17, 4  ;;  %v580_v24 = vrot.slane %v1773_v63, 5  ;;  %v2024_v63 = vld [vmem:[%s1631_s25 + $0x60] sm:$0xf] }
  0x3f   : > { %465 = vrot.lane.b32.xlu0 %v1820_v55, %s1563_s26  ;;  %463 = vrot.lane.b32.xlu2 %v1827_v60, %s1563_s26 }
  0x40   : > { %v1951_v53 = vsel %vm1833_vm5, %v1400_v46, %v584_v41  ;;  %v1957_v50 = vsel %vm1833_vm5, %v579_v49, %v580_v24 }
  0x46   : > { %589 = vrot.lane.b32.xlu1 %v536_v14, %s1564_s27  ;;  %v570_v14 = vrot.slane %v1725_v15, 5 }
  0x47   : > { %471 = vrot.lane.b32.xlu0 %v1844_v20, %s1563_s26  ;;  %469 = vrot.lane.b32.xlu2 %v1849_v25, %s1563_s26  ;;  %s2385_s26 = scalar_lea.vmem %s2456_s3, %s1389_s23 }
  0x48   : > { %v572_v27 = vrot.slane %v570_v14, 4  ;;  %v1936_v11 = vsel %vm1833_vm5, %v1398_v39, %v570_v14 }
  0x4a   : > { %v1930_v45 = vsel %vm1833_vm5, %v572_v27, %v573_v32 }
  0x4e   : > { %595 = vrot.lane.b32.xlu1 %v1860_v43, %s1564_s27 }
  0x4f   : > { %593 = vrot.lane.b32.xlu0 %v1864_v44, %s1564_s27  ;;  %591 = vrot.lane.b32.xlu2 %v539_v10, %s1564_s27  ;;  %v586_v10 = vrot.slane %v584_v41, 4 }
  0x51   : > { %v1947_v51 = vsel %vm1833_vm5, %v586_v10, %v587_v16 }
  0x56   : > { %601 = vrot.lane.b32.xlu1 %v1880_v52, %s1564_s27 }
  0x57   : > { %599 = vrot.lane.b32.xlu0 %v1885_v36, %s1564_s27  ;;  %597 = vrot.lane.b32.xlu2 %v1891_v4, %s1564_s27 }
  0x5e   : > { %607 = vrot.lane.b32.xlu1 %v1902_v9, %s1564_s27 }
  0x5f   : > { %605 = vrot.lane.b32.xlu0 %v1906_v12, %s1564_s27  ;;  %603 = vrot.lane.b32.xlu2 %v1913_v22, %s1564_s27 }
  0x66   : > { %613 = vrot.lane.b32.xlu1 %v1925_v40, %s1564_s27 }
  0x67   : > { %611 = vrot.lane.b32.xlu0 %v1930_v45, %s1564_s27  ;;  %609 = vrot.lane.b32.xlu2 %v1936_v11, %s1564_s27 }
  0x6e   : > { %619 = vrot.lane.b32.xlu1 %v1947_v51, %s1564_s27 }
  0x6f   : > { %617 = vrot.lane.b32.xlu0 %v1951_v53, %s1564_s27  ;;  %615 = vrot.lane.b32.xlu2 %v1957_v50, %s1564_s27 }
  0x76   : > { %660 = vrot.lane.b32.xlu1 %v1681_v37, %s1565_s28 }
  0x77   : > { %658 = vrot.lane.b32.xlu0 %v1637_v1, %s1565_s28  ;;  %656 = vrot.lane.b32.xlu2 %v1634_v0, %s1565_s28 }
  0x7e   : > { %666 = vrot.lane.b32.xlu1 %v1660_v21, %s1565_s28 }
  0x7f   : > { %664 = vrot.lane.b32.xlu0 %v1673_v31, %s1565_s28  ;;  %662 = vrot.lane.b32.xlu2 %v1690_v42, %s1565_s28 }
  0x81   : > { %v450_v0 = vpop.permute.xlu2 %449 }
  0x82   : > { %494 = vst.msk [vmem:[#allocation2 + $0x10] sm:$0xf] %vm489_vm7, %v450_v0 }
  0x86   : > { %672 = vrot.lane.b32.xlu1 %v1697_v47, %s1565_s28 }
  0x87   : > { %670 = vrot.lane.b32.xlu0 %v1707_v58, %s1565_s28  ;;  %668 = vrot.lane.b32.xlu2 %v1740_v29, %s1565_s28 }
  0x89   : > { %v452_v1 = vpop.permute.xlu2 %451 }
  0x8a   : > { %495 = vst.msk [vmem:[#allocation2 + $0x14] sm:$0xf] %vm489_vm7, %v452_v1  ;;  %v722_v1 = vshrl.u32 %v2024_v63, 16 }
  0x8e   : > { %678 = vrot.lane.b32.xlu1 %v1737_v28, %s1565_s28 }
  0x8f   : > { %676 = vrot.lane.b32.xlu0 %v1750_v33, %s1565_s28  ;;  %674 = vrot.lane.b32.xlu2 %v1725_v15, %s1565_s28 }
  0x90   : > { %v446_v2 = vpop.permute.xlu1 %445 }
  0x91   : > { %492 = vst.msk [vmem:[#allocation2 + $0x8] sm:$0xf] %vm489_vm7, %v446_v2  ;;  %v442_v6 = vpop.permute.xlu0 %441  ;;  %v458_v59 = vpop.permute.xlu2 %457  ;;  %v725_v2 = vshll.u32 %v2024_v63, 16 }
  0x92   : > { %490 = vst.msk [vmem:[#allocation2] sm:$0xf] %vm489_vm7, %v442_v6  ;;  %v724_v6 = vrot.slane %v722_v1, 4 }
  0x93   : > { %498 = vst.msk [vmem:[#allocation2 + $0x20] sm:$0xf] %vm489_vm7, %v458_v59  ;;  %v727_v59 = vrot.slane %v725_v2, 5 }
  0x96   : > { %684 = vrot.lane.b32.xlu1 %v2024_v63, %s1565_s28 }
  0x97   : > { %682 = vrot.lane.b32.xlu0 %v1779_v8, %s1565_s28  ;;  %680 = vrot.lane.b32.xlu2 %v1790_v18, %s1565_s28 }
  0x98   : > { %v448_v62 = vpop.permute.xlu1 %447 }
  0x99   : > { %493 = vst.msk [vmem:[#allocation2 + $0xc] sm:$0xf] %vm489_vm7, %v448_v62  ;;  %v444_v3 = vpop.permute.xlu0 %443  ;;  %v464_v57 = vpop.permute.xlu2 %463 }
  0x9a   : > { %491 = vst.msk [vmem:[#allocation2 + $0x4] sm:$0xf] %vm489_vm7, %v444_v3 }
  0x9b   : > { %501 = vst.msk [vmem:[#allocation2 + $0x2c] sm:$0xf] %vm489_vm7, %v464_v57  ;;  %v728_v57 = vor.u32 %v727_v59, %v724_v6 }
  0x9e   : > { %747 = vrot.lane.b32.xlu1 %v1712_v61, %s1566_s29 }
  0x9f   : > { %745 = vrot.lane.b32.xlu0 %v1685_v38, %s1566_s29  ;;  %686 = vrot.lane.b32.xlu2 %v2039_v7, %s1565_s28 }
  0xa0   : > { %v456_v14 = vpop.permute.xlu1 %455 }
  0xa1   : > { %497 = vst.msk [vmem:[#allocation2 + $0x1c] sm:$0xf] %vm489_vm7, %v456_v14  ;;  %v454_v35 = vpop.permute.xlu0 %453  ;;  %v470_v17 = vpop.permute.xlu2 %469  ;;  %v731_v14 = vshll.u32 %v2039_v7, 16 }
  0xa2   : > { %496 = vst.msk [vmem:[#allocation2 + $0x18] sm:$0xf] %vm489_vm7, %v454_v35 }
  0xa3   : > { %504 = vst.msk [vmem:[#allocation2 + $0x38] sm:$0xf] %vm489_vm7, %v470_v17  ;;  %v729_v17 = vrot.slane %v728_v57, 4 }
  0xa6   : > { %753 = vrot.lane.b32.xlu1 %v1760_v48, %s1566_s29 }
  0xa7   : > { %751 = vrot.lane.b32.xlu0 %v1768_v56, %s1566_s29  ;;  %749 = vrot.lane.b32.xlu2 %v1734_v23, %s1566_s29 }
  0xa8   : > { %v462_v61 = vpop.permute.xlu1 %461 }
  0xa9   : > { %500 = vst.msk [vmem:[#allocation2 + $0x28] sm:$0xf] %vm489_vm7, %v462_v61  ;;  %v460_v38 = vpop.permute.xlu0 %459  ;;  %v592_v27 = vpop.permute.xlu2 %591  ;;  %v733_v61 = vrot.slane %v731_v14, 5 }
  0xaa   : > { %499 = vst.msk [vmem:[#allocation2 + $0x24] sm:$0xf] %vm489_vm7, %v460_v38 }
  0xab   : > { %639 = vst.msk [vmem:[#allocation2 + $0x4] sm:$0xf] %vm637_vm8, %v592_v27 }
  0xae   : > { %759 = vrot.lane.b32.xlu1 %v1794_v19, %s1566_s29 }
  0xaf   : > { %757 = vrot.lane.b32.xlu0 %v1803_v34, %s1566_s29  ;;  %755 = vrot.lane.b32.xlu2 %v1744_v30, %s1566_s29 }
  0xb0   : > { %v468_v32 = vpop.permute.xlu1 %467 }
  0xb1   : > { %503 = vst.msk [vmem:[#allocation2 + $0x34] sm:$0xf] %vm489_vm7, %v468_v32  ;;  %v466_v39 = vpop.permute.xlu0 %465  ;;  %v598_v41 = vpop.permute.xlu2 %597  ;;  %v813_v32 = vrot.slane %v2039_v7, 5 }
  0xb2   : > { %502 = vst.msk [vmem:[#allocation2 + $0x30] sm:$0xf] %vm489_vm7, %v466_v39 }
  0xb3   : > { %642 = vst.msk [vmem:[#allocation2 + $0x10] sm:$0xf] %vm637_vm8, %v598_v41  ;;  %v1401_v41 = vrot.slane %v2024_v63, 9 }
  0xb6   : > { %769 = vrot.lane.b32.xlu1 %v1849_v25, %s1566_s29 }
  0xb7   : > { %763 = vrot.lane.b32.xlu0 %v1827_v60, %s1566_s29  ;;  %761 = vrot.lane.b32.xlu2 %v1786_v13, %s1566_s29 }
  0xb8   : > { %v590_v10 = vpop.permute.xlu1 %589 }
  0xb9   : > { %638 = vst.msk [vmem:[#allocation2] sm:$0xf] %vm637_vm8, %v590_v10  ;;  %v472_v16 = vpop.permute.xlu0 %471  ;;  %v604_v46 = vpop.permute.xlu2 %603  ;;  %v2109_v10 = vsel %vm1666_vm2, %v729_v17, %v733_v61 }
  0xba   : > { %505 = vst.msk [vmem:[#allocation2 + $0x3c] sm:$0xf] %vm489_vm7, %v472_v16 }
  0xbb   : > { %645 = vst.msk [vmem:[#allocation2 + $0x1c] sm:$0xf] %vm637_vm8, %v604_v46  ;;  %v2114_v46 = vsel %vm1833_vm5, %v1401_v41, %v813_v32 }
  0xbe   : > { %836 = vrot.lane.b32.xlu1 %v1930_v45, %s1567_s30 }
  0xbf   : > { %834 = vrot.lane.b32.xlu0 %v1936_v11, %s1567_s30  ;;  %771 = vrot.lane.b32.xlu2 %v1844_v20, %s1566_s29 }
  0xc0   : > { %v596_v49 = vpop.permute.xlu1 %595 }
  0xc1   : > { %641 = vst.msk [vmem:[#allocation2 + $0xc] sm:$0xf] %vm637_vm8, %v596_v49  ;;  %v594_v24 = vpop.permute.xlu0 %593  ;;  %v610_v0 = vpop.permute.xlu2 %609 }
  0xc2   : > { %640 = vst.msk [vmem:[#allocation2 + $0x8] sm:$0xf] %vm637_vm8, %v594_v24 }
  0xc3   : > { %648 = vst.msk [vmem:[#allocation2 + $0x28] sm:$0xf] %vm637_vm8, %v610_v0 }
  0xc6   : > { %901 = vrot.lane.b32.xlu1 %v1750_v33, %s1568_s4  ;;  %v735_v33 = vshrl.u32 %v2039_v7, 16 }
  0xc7   : > { %844 = vrot.lane.b32.xlu0 %v1947_v51, %s1567_s30  ;;  %842 = vrot.lane.b32.xlu2 %v1951_v53, %s1567_s30 }
  0xc8   : > { %v602_v62 = vpop.permute.xlu1 %601  ;;  %v737_v39 = vrot.slane %v735_v33, 4 }
  0xc9   : > { %644 = vst.msk [vmem:[#allocation2 + $0x18] sm:$0xf] %vm637_vm8, %v602_v62  ;;  %v600_v3 = vpop.permute.xlu0 %599  ;;  %v616_v35 = vpop.permute.xlu2 %615  ;;  %v815_v62 = vrot.slane %v813_v32, 4 }
  0xca   : > { %643 = vst.msk [vmem:[#allocation2 + $0x14] sm:$0xf] %vm637_vm8, %v600_v3 }
  0xcb   : > { %651 = vst.msk [vmem:[#allocation2 + $0x34] sm:$0xf] %vm637_vm8, %v616_v35 }
  0xce   : > { %911 = vrot.lane.b32.xlu1 %v2039_v7, %s1568_s4  ;;  %v738_v7 = vor.u32 %v737_v39, %v733_v61 }
  0xcf   : > { %909 = vrot.lane.b32.xlu0 %v2024_v63, %s1568_s4  ;;  %903 = vrot.lane.b32.xlu2 %v1737_v28, %s1568_s4  ;;  %v225_v28 = vld [vmem:[%s1631_s25 + $0x68] sm:$0x1] }
  0xd0   : > { %v608_v38 = vpop.permute.xlu1 %607  ;;  %v741_v49 = vshll.u32 %v225_v28, 16  ;;  %v739_v0 = vrot.slane %v738_v7, 4  ;;  %v816_v3 = vrot.slane %v225_v28, 5 }
  0xd1   : > { %647 = vst.msk [vmem:[#allocation2 + $0x24] sm:$0xf] %vm637_vm8, %v608_v38  ;;  %v606_v27 = vpop.permute.xlu0 %605  ;;  %v657_v16 = vpop.permute.xlu2 %656 }
  0xd2   : > { %646 = vst.msk [vmem:[#allocation2 + $0x20] sm:$0xf] %vm637_vm8, %v606_v27  ;;  %v743_v1 = vrot.slane %v741_v49, 5  ;;  %v2140_v35 = vsel %vm1833_vm5, %v815_v62, %v816_v3 }
  0xd3   : > { %705 = vst.msk [vmem:[#allocation2] sm:$0xf] %vm704_vm9, %v657_v16 }
  0xd4   : > { %v2130_v6 = vsel %vm1666_vm2, %v739_v0, %v743_v1 }
  0xd6   : > { %998 = vrot.lane.b32.xlu1 %v2109_v10, %s1569_s5 }
  0xd7   : > { %992 = vrot.lane.b32.xlu0 %v1816_v54, %s1569_s5  ;;  %990 = vrot.lane.b32.xlu2 %v1820_v55, %s1569_s5 }
  0xd8   : > { %v614_v63 = vpop.permute.xlu1 %613 }
  0xd9   : > { %650 = vst.msk [vmem:[#allocation2 + $0x30] sm:$0xf] %vm637_vm8, %v614_v63  ;;  %v612_v24 = vpop.permute.xlu0 %611  ;;  %v663_v2 = vpop.permute.xlu2 %662 }
  0xda   : > { %649 = vst.msk [vmem:[#allocation2 + $0x2c] sm:$0xf] %vm637_vm8, %v612_v24 }
  0xdb   : > { %708 = vst.msk [vmem:[#allocation2 + $0xc] sm:$0xf] %vm704_vm9, %v663_v2  ;;  %v2225_v2 = vld [vmem:[%s1631_s25 + $0x70] sm:$0xf] }
  0xde   : > { %1065 = vrot.lane.b32.xlu1 %v1957_v50, %s1570_s6 }
  0xdf   : > { %1063 = vrot.lane.b32.xlu0 %v1925_v40, %s1570_s6  ;;  %1000 = vrot.lane.b32.xlu2 %v2130_v6, %s1569_s5 }
  0xe0   : > { %v620_v59 = vpop.permute.xlu1 %619 }
  0xe1   : > { %653 = vst.msk [vmem:[#allocation2 + $0x3c] sm:$0xf] %vm637_vm8, %v620_v59  ;;  %v618_v57 = vpop.permute.xlu0 %617  ;;  %v669_v14 = vpop.permute.xlu2 %668  ;;  %v960_v59 = vshll.u32 %v2225_v2, 16 }
  0xe2   : > { %652 = vst.msk [vmem:[#allocation2 + $0x38] sm:$0xf] %vm637_vm8, %v618_v57 }
  0xe3   : > { %711 = vst.msk [vmem:[#allocation2 + $0x18] sm:$0xf] %vm704_vm9, %v669_v14  ;;  %v964_v14 = vshrl.u32 %v2225_v2, 16 }
  0xe6   : > { %818 = vrot.lane.b32.xlu1 %v1864_v44, %s1567_s30 }
  0xe7   : > { %1073 = vrot.lane.b32.xlu0 %v2140_v35, %s1570_s6  ;;  %1071 = vrot.lane.b32.xlu2 %v2114_v46, %s1570_s6 }
  0xe8   : > { %v661_v33 = vpop.permute.xlu1 %660 }
  0xe9   : > { %707 = vst.msk [vmem:[#allocation2 + $0x8] sm:$0xf] %vm704_vm9, %v661_v33  ;;  %v659_v17 = vpop.permute.xlu0 %658  ;;  %v675_v61 = vpop.permute.xlu2 %674 }
  0xea   : > { %706 = vst.msk [vmem:[#allocation2 + $0x4] sm:$0xf] %vm704_vm9, %v659_v17 }
  0xeb   : > { %714 = vst.msk [vmem:[#allocation2 + $0x24] sm:$0xf] %vm704_vm9, %v675_v61 }
  0xee   : > { %828 = vrot.lane.b32.xlu1 %v1913_v22, %s1567_s30 }
  0xef   : > { %826 = vrot.lane.b32.xlu0 %v1880_v52, %s1567_s30  ;;  %820 = vrot.lane.b32.xlu2 %v1860_v43, %s1567_s30 }
  0xf0   : > { %v667_v44 = vpop.permute.xlu1 %666 }
  0xf1   : > { %710 = vst.msk [vmem:[#allocation2 + $0x14] sm:$0xf] %vm704_vm9, %v667_v44  ;;  %v665_v38 = vpop.permute.xlu0 %664  ;;  %v681_v27 = vpop.permute.xlu2 %680  ;;  %v966_v44 = vrot.slane %v964_v14, 4 }
  0xf2   : > { %709 = vst.msk [vmem:[#allocation2 + $0x10] sm:$0xf] %vm704_vm9, %v665_v38  ;;  %v1463_v38 = vld [vmem:[%s2454_s1 + $0x8] sm:$0xff] }
  0xf3   : > { %717 = vst.msk [vmem:[#allocation2 + $0x30] sm:$0xf] %vm704_vm9, %v681_v27 }
  0xf6   : > { %893 = vrot.lane.b32.xlu1 %v1740_v29, %s1568_s4 }
  0xf7   : > { %887 = vrot.lane.b32.xlu0 %v1690_v42, %s1568_s4  ;;  %885 = vrot.lane.b32.xlu2 %v1681_v37, %s1568_s4 }
  0xf8   : > { %v673_v32 = vpop.permute.xlu1 %672 }
  0xf9   : > { %713 = vst.msk [vmem:[#allocation2 + $0x20] sm:$0xf] %vm704_vm9, %v673_v32  ;;  %v671_v39 = vpop.permute.xlu0 %670  ;;  %v687_v43 = vpop.permute.xlu2 %686 }
  0xfa   : > { %712 = vst.msk [vmem:[#allocation2 + $0x1c] sm:$0xf] %vm704_vm9, %v671_v39  ;;  %v228_v39 = vld [vmem:[%s1631_s25 + $0x74] sm:$0x1] }
  0xfb   : > { %720 = vst.msk [vmem:[#allocation2 + $0x3c] sm:$0xf] %vm704_vm9, %v687_v43  ;;  %v970_v43 = vshll.u32 %v228_v39, 16 }
  0xfe   : > { %976 = vrot.lane.b32.xlu1 %v1768_v56, %s1569_s5 }
  0xff   : > { %974 = vrot.lane.b32.xlu0 %v1734_v23, %s1569_s5  ;;  %895 = vrot.lane.b32.xlu2 %v1707_v58, %s1568_s4 }
 0x100   : > { %v679_v29 = vpop.permute.xlu1 %678 }
 0x101   : > { %716 = vst.msk [vmem:[#allocation2 + $0x2c] sm:$0xf] %vm704_vm9, %v679_v29  ;;  %v677_v42 = vpop.permute.xlu0 %676  ;;  %v750_v37 = vpop.permute.xlu2 %749  ;;  %v1462_v29 = vld [vmem:[%s2454_s1] sm:$0xff] }
 0x102   : > { %715 = vst.msk [vmem:[#allocation2 + $0x28] sm:$0xf] %vm704_vm9, %v677_v42 }
 0x103   : > { %796 = vst.msk [vmem:[#allocation2 + $0x8] sm:$0xf] %vm793_vm10, %v750_v37 }
 0x106   : > { %1047 = vrot.lane.b32.xlu1 %v1891_v4, %s1570_s6 }
 0x107   : > { %984 = vrot.lane.b32.xlu0 %v1794_v19, %s1569_s5  ;;  %982 = vrot.lane.b32.xlu2 %v1803_v34, %s1569_s5 }
 0x108   : > { %v685_v23 = vpop.permute.xlu1 %684 }
 0x109   : > { %719 = vst.msk [vmem:[#allocation2 + $0x38] sm:$0xf] %vm704_vm9, %v685_v23  ;;  %v683_v56 = vpop.permute.xlu0 %682  ;;  %v756_v58 = vpop.permute.xlu2 %755 }
 0x10a   : > { %718 = vst.msk [vmem:[#allocation2 + $0x34] sm:$0xf] %vm704_vm9, %v683_v56  ;;  %v972_v56 = vrot.slane %v970_v43, 5 }
 0x10b   : > { %799 = vst.msk [vmem:[#allocation2 + $0x14] sm:$0xf] %vm793_vm10, %v756_v58 }
 0x10e   : > { %1057 = vrot.lane.b32.xlu1 %v1902_v9, %s1570_s6 }
 0x10f   : > { %1055 = vrot.lane.b32.xlu0 %v1906_v12, %s1570_s6  ;;  %1049 = vrot.lane.b32.xlu2 %v1885_v36, %s1570_s6 }
 0x110   : > { %v748_v41 = vpop.permute.xlu1 %747 }
 0x111   : > { %795 = vst.msk [vmem:[#allocation2 + $0x4] sm:$0xf] %vm793_vm10, %v748_v41  ;;  %v746_v19 = vpop.permute.xlu0 %745  ;;  %v762_v34 = vpop.permute.xlu2 %761 }
 0x112   : > { %794 = vst.msk [vmem:[#allocation2] sm:$0xf] %vm793_vm10, %v746_v19 }
 0x113   : > { %802 = vst.msk [vmem:[#allocation2 + $0x20] sm:$0xf] %vm793_vm10, %v762_v34  ;;  %v1045_v34 = vrot.slane %v228_v39, 5 }
 0x116   : > { %773 = vrot.lane.b32.xlu1 %v2109_v10, %s1566_s29 }
 0x117   : > { %767 = vrot.lane.b32.xlu0 %v1816_v54, %s1566_s29  ;;  %765 = vrot.lane.b32.xlu2 %v1820_v55, %s1566_s29  ;;  %v2211_v54 = vld [vmem:[%s1631_s25 + $0x6c] sm:$0xf] }
 0x118   : > { %v754_v16 = vpop.permute.xlu1 %753  ;;  %v951_v55 = vshrl.u32 %v2211_v54, 16  ;;  %v954_v63 = vshll.u32 %v2211_v54, 16 }
 0x119   : > { %798 = vst.msk [vmem:[#allocation2 + $0x10] sm:$0xf] %vm793_vm10, %v754_v16  ;;  %v752_v28 = vpop.permute.xlu0 %751  ;;  %v772_v7 = vpop.permute.xlu2 %771 }
 0x11a   : > { %797 = vst.msk [vmem:[#allocation2 + $0xc] sm:$0xf] %vm793_vm10, %v752_v28  ;;  %v956_v24 = vrot.slane %v954_v63, 5  ;;  %v1402_v28 = vrot.slane %v2211_v54, 9 }
 0x11b   : > { %807 = vst.msk [vmem:[#allocation2 + $0x34] sm:$0xf] %vm793_vm10, %v772_v7 }
 0x11e   : > { %840 = vrot.lane.b32.xlu1 %v1957_v50, %s1567_s30 }
 0x11f   : > { %838 = vrot.lane.b32.xlu0 %v1925_v40, %s1567_s30  ;;  %775 = vrot.lane.b32.xlu2 %v2130_v6, %s1566_s29  ;;  %v953_v40 = vrot.slane %v951_v55, 4 }
 0x120   : > { %v760_v10 = vpop.permute.xlu1 %759 }
 0x121   : > { %801 = vst.msk [vmem:[#allocation2 + $0x1c] sm:$0xf] %vm793_vm10, %v760_v10  ;;  %v758_v49 = vpop.permute.xlu0 %757  ;;  %v843_v50 = vpop.permute.xlu2 %842  ;;  %v957_v6 = vor.u32 %v956_v24, %v953_v40 }
 0x122   : > { %800 = vst.msk [vmem:[#allocation2 + $0x18] sm:$0xf] %vm793_vm10, %v758_v49 }
 0x126   : > { %905 = vrot.lane.b32.xlu1 %v1790_v18, %s1568_s4  ;;  %v1132_v18 = vld [vmem:[%s2454_s1 + $0x10] sm:$0x3] }
 0x127   : > { %848 = vrot.lane.b32.xlu0 %v2140_v35, %s1567_s30  ;;  %846 = vrot.lane.b32.xlu2 %v2114_v46, %s1567_s30  ;;  %v1186_v3 = vunpack.c.l.b16 %v1132_v18  ;;  %v958_v46 = vrot.slane %v957_v6, 4  ;;  %v962_v35 = vrot.slane %v960_v59, 5 }
 0x128   : > { %v770_v0 = vpop.permute.xlu1 %769 }
 0x129   : > { %806 = vst.msk [vmem:[#allocation2 + $0x30] sm:$0xf] %vm793_vm10, %v770_v0  ;;  %v764_v1 = vpop.permute.xlu0 %763  ;;  %v904_v62 = vpop.permute.xlu2 %903  ;;  %v1189_v57 = vpack.c.b16 %v1186_v3, %v1186_v3  ;;  %v963_v27 = vsel %vm1666_vm2, %v958_v46, %v962_v35 }
 0x12a   : > { %803 = vst.msk [vmem:[#allocation2 + $0x24] sm:$0xf] %vm793_vm10, %v764_v1 }
 0x12b   : > { %879 = vst.msk [vmem:[#allocation2 + $0x30] sm:$0xf] %vm866_vm11, %v843_v50  ;;  %v1219_v33 = vsel %vm1217_vm12, %v1189_v57, 0 }
 0x12c   : > { %1465 = vmatpush.bf16.msra.mxu2 %v1219_v33  ;;  %1466 = vmatpush.bf16.msra.mxu3 %v1219_v33 }
 0x12d   : > { %1226 = vmatpush.bf16.msra.mxu0 %v1219_v33  ;;  %1464 = vmatpush.bf16.msra.mxu1 %v1219_v33 }
 0x12e   : > { %915 = vrot.lane.b32.xlu1 %v2225_v2, %s1568_s4 }
 0x12f   : > { %913 = vrot.lane.b32.xlu0 %v2211_v54, %s1568_s4  ;;  %907 = vrot.lane.b32.xlu2 %v1779_v8, %s1568_s4  ;;  %v967_v8 = vor.u32 %v966_v44, %v962_v35 }
 0x130   : > { %v837_v17 = vpop.permute.xlu1 %836  ;;  %1468 = vmatpush.bf16.msra.mxu2 %v1463_v38  ;;  %1469 = vmatpush.bf16.msra.mxu3 %v1463_v38 }
 0x131   : > { %876 = vst.msk [vmem:[#allocation2 + $0x24] sm:$0xf] %vm866_vm11, %v837_v17  ;;  %v835_v61 = vpop.permute.xlu0 %834  ;;  %v991_v32 = vpop.permute.xlu2 %990  ;;  %1227 = vmatpush.bf16.msra.mxu0 %v1463_v38  ;;  %1467 = vmatpush.bf16.msra.mxu1 %v1463_v38  ;;  %v968_v23 = vrot.slane %v967_v8, 4 }
 0x132   : > { %875 = vst.msk [vmem:[#allocation2 + $0x20] sm:$0xf] %vm866_vm11, %v835_v61 }
 0x133   : > { %943 = vst.msk [vmem:[#allocation2 + $0x24] sm:$0xf] %vm933_vm13, %v904_v62  ;;  %v973_v41 = vsel %vm1666_vm2, %v968_v23, %v972_v56 }
 0x134   : > { %1471 = vmatpush.bf16.msra.mxu2 %v1462_v29  ;;  %1472 = vmatpush.bf16.msra.mxu3 %v1462_v29 }
 0x135   : > { %1228 = vmatpush.bf16.msra.mxu0 %v1462_v29  ;;  %1470 = vmatpush.bf16.msra.mxu1 %v1462_v29 }
 0x136   : > { %1002 = vrot.lane.b32.xlu1 %v963_v27, %s1569_s5 }
 0x137   : > { %996 = vrot.lane.b32.xlu0 %v1844_v20, %s1569_s5  ;;  %994 = vrot.lane.b32.xlu2 %v1849_v25, %s1569_s5  ;;  %v1042_v20 = vrot.slane %v2225_v2, 5 }
 0x138   : > { %v902_v42 = vpop.permute.xlu1 %901 }
 0x139   : > { %942 = vst.msk [vmem:[#allocation2 + $0x20] sm:$0xf] %vm933_vm13, %v902_v42  ;;  %v845_v37 = vpop.permute.xlu0 %844  ;;  %v1001_v58 = vpop.permute.xlu2 %1000  ;;  %v1044_v19 = vrot.slane %v1042_v20, 4 }
 0x13a   : > { %880 = vst.msk [vmem:[#allocation2 + $0x34] sm:$0xf] %vm866_vm11, %v845_v37 }
 0x13b   : > { %1031 = vst.msk [vmem:[#allocation2 + $0x20] sm:$0xf] %vm1022_vm14, %v991_v32  ;;  %v1046_v26 = vsel %vm1833_vm5, %v1044_v19, %v1045_v34 }
 0x13e   : > { %1069 = vrot.lane.b32.xlu1 %v1947_v51, %s1570_s6 }
 0x13f   : > { %1067 = vrot.lane.b32.xlu0 %v1951_v53, %s1570_s6  ;;  %1004 = vrot.lane.b32.xlu2 %v973_v41, %s1569_s5  ;;  %v1043_v53 = vsel %vm1833_vm5, %v1402_v28, %v1042_v20 }
 0x140   : > { %v912_v25 = vpop.permute.xlu1 %911 }
 0x141   : > { %947 = vst.msk [vmem:[#allocation2 + $0x34] sm:$0xf] %vm933_vm13, %v912_v25  ;;  %v910_v16 = vpop.permute.xlu0 %909  ;;  %v1072_v51 = vpop.permute.xlu2 %1071 }
 0x142   : > { %946 = vst.msk [vmem:[#allocation2 + $0x30] sm:$0xf] %vm933_vm13, %v910_v16 }
 0x143   : > { %1036 = vst.msk [vmem:[#allocation2 + $0x34] sm:$0xf] %vm1022_vm14, %v1001_v58 }
 0x146   : > { %822 = vrot.lane.b32.xlu1 %v1891_v4, %s1567_s30 }
 0x147   : > { %1077 = vrot.lane.b32.xlu0 %v1046_v26, %s1570_s6  ;;  %1075 = vrot.lane.b32.xlu2 %v1043_v53, %s1570_s6 }
 0x148   : > { %v999_v7 = vpop.permute.xlu1 %998 }
 0x149   : > { %1035 = vst.msk [vmem:[#allocation2 + $0x30] sm:$0xf] %vm1022_vm14, %v999_v7  ;;  %v993_v10 = vpop.permute.xlu0 %992  ;;  %v821_v54 = vpop.permute.xlu2 %820 }
 0x14a   : > { %1032 = vst.msk [vmem:[#allocation2 + $0x24] sm:$0xf] %vm1022_vm14, %v993_v10 }
 0x14b   : > { %1108 = vst.msk [vmem:[#allocation2 + $0x30] sm:$0xf] %vm1095_vm15, %v1072_v51  ;;  %v2379_v51 = vld [vmem:[%s2455_s2] ss:$0 sm:$0xff] }
 0x14c   : > { %868 = vst.msk [vmem:[#allocation2 + $0x4] sm:$0xf] %vm866_vm11, %v821_v54 }
 0x14e   : > { %832 = vrot.lane.b32.xlu1 %v1902_v9, %s1567_s30 }
 0x14f   : > { %830 = vrot.lane.b32.xlu0 %v1906_v12, %s1567_s30  ;;  %824 = vrot.lane.b32.xlu2 %v1885_v36, %s1567_s30 }
 0x150   : > { %v1066_v5 = vpop.permute.xlu1 %1065 }
 0x151   : > { %1105 = vst.msk [vmem:[#allocation2 + $0x24] sm:$0xf] %vm1095_vm15, %v1066_v5  ;;  %v1064_v4 = vpop.permute.xlu0 %1063  ;;  %v886_v49 = vpop.permute.xlu2 %885 }
 0x152   : > { %1104 = vst.msk [vmem:[#allocation2 + $0x20] sm:$0xf] %vm1095_vm15, %v1064_v4 }
 0x156   : > { %897 = vrot.lane.b32.xlu1 %v1697_v47, %s1568_s4 }
 0x157   : > { %891 = vrot.lane.b32.xlu0 %v1660_v21, %s1568_s4  ;;  %889 = vrot.lane.b32.xlu2 %v1673_v31, %s1568_s4 }
 0x158   : > { %v819_v9 = vpop.permute.xlu1 %818 }
 0x159   : > { %867 = vst.msk [vmem:[#allocation2] sm:$0xf] %vm866_vm11, %v819_v9  ;;  %v1074_v12 = vpop.permute.xlu0 %1073  ;;  %v1458_v55 = vld [vmem:[#allocation2 + $0x20] sm:$0xff]  ;;  %v896_v36 = vpop.permute.xlu2 %895 }
 0x15a   : > { %1109 = vst.msk [vmem:[#allocation2 + $0x34] sm:$0xf] %vm1095_vm15, %v1074_v12  ;;  %1447 = vmatmul.msk.bf16.vlgmr.msra.gmra.mxu2 %vm1192_vm0, %v1458_v55 }
 0x15b   : > { %934 = vst.msk [vmem:[#allocation2] sm:$0xf] %vm933_vm13, %v886_v49 }
 0x15e   : > { %980 = vrot.lane.b32.xlu1 %v1744_v30, %s1569_s5 }
 0x15f   : > { %978 = vrot.lane.b32.xlu0 %v1760_v48, %s1569_s5  ;;  %899 = vrot.lane.b32.xlu2 %v1725_v15, %s1568_s4 }
 0x160   : > { %v829_v21 = vpop.permute.xlu1 %828 }
 0x161   : > { %872 = vst.msk [vmem:[#allocation2 + $0x14] sm:$0xf] %vm866_vm11, %v829_v21  ;;  %v827_v47 = vpop.permute.xlu0 %826  ;;  %v1460_v63 = vld [vmem:[#allocation2 + $0x30] sm:$0xff]  ;;  %v983_v31 = vpop.permute.xlu2 %982 }
 0x162   : > { %871 = vst.msk [vmem:[#allocation2 + $0x10] sm:$0xf] %vm866_vm11, %v827_v47  ;;  %1449 = vmatmul.msk.bf16.vlgmr.msra.gmra.mxu3 %vm1192_vm0, %v1460_v63 }
 0x163   : > { %939 = vst.msk [vmem:[#allocation2 + $0x14] sm:$0xf] %vm933_vm13, %v896_v36 }
 0x166   : > { %1051 = vrot.lane.b32.xlu1 %v1880_v52, %s1570_s6 }
 0x167   : > { %988 = vrot.lane.b32.xlu0 %v1827_v60, %s1569_s5  ;;  %986 = vrot.lane.b32.xlu2 %v1786_v13, %s1569_s5 }
 0x168   : > { %v894_v30 = vpop.permute.xlu1 %893 }
 0x169   : > { %938 = vst.msk [vmem:[#allocation2 + $0x10] sm:$0xf] %vm933_vm13, %v894_v30  ;;  %v888_v48 = vpop.permute.xlu0 %887  ;;  %v1050_v15 = vpop.permute.xlu2 %1049 }
 0x16a   : > { %935 = vst.msk [vmem:[#allocation2 + $0x4] sm:$0xf] %vm933_vm13, %v888_v48 }
 0x16b   : > { %1027 = vst.msk [vmem:[#allocation2 + $0x10] sm:$0xf] %vm1022_vm14, %v983_v31 }
 0x16e   : > { %1061 = vrot.lane.b32.xlu1 %v1930_v45, %s1570_s6 }
 0x16f   : > { %1059 = vrot.lane.b32.xlu0 %v1936_v11, %s1570_s6  ;;  %1053 = vrot.lane.b32.xlu2 %v1913_v22, %s1570_s6 }
 0x170   : > { %v977_v52 = vpop.permute.xlu1 %976 }
 0x171   : > { %1024 = vst.msk [vmem:[#allocation2 + $0x4] sm:$0xf] %vm1022_vm14, %v977_v52  ;;  %v975_v60 = vpop.permute.xlu0 %974  ;;  %v766_v13 = vpop.permute.xlu2 %765 }
 0x172   : > { %1023 = vst.msk [vmem:[#allocation2] sm:$0xf] %vm1022_vm14, %v975_v60 }
 0x173   : > { %1097 = vst.msk [vmem:[#allocation2 + $0x4] sm:$0xf] %vm1095_vm15, %v1050_v15 }
 0x174   : > { %804 = vst.msk [vmem:[#allocation2 + $0x28] sm:$0xf] %vm793_vm10, %v766_v13 }
 0x178   : > { %v1048_v50 = vpop.permute.xlu1 %1047 }
 0x179   : > { %1096 = vst.msk [vmem:[#allocation2] sm:$0xf] %vm1095_vm15, %v1048_v50  ;;  %v985_v45 = vpop.permute.xlu0 %984  ;;  %v776_v11 = vpop.permute.xlu2 %775 }
 0x17a   : > { %1028 = vst.msk [vmem:[#allocation2 + $0x14] sm:$0xf] %vm1022_vm14, %v985_v45 }
 0x17b   : > { %809 = vst.msk [vmem:[#allocation2 + $0x3c] sm:$0xf] %vm793_vm10, %v776_v11 }
 0x180   : > { %v1058_v40 = vpop.permute.xlu1 %1057  ;;  %v1454_v24 = vld [vmem:[#allocation2] sm:$0xff] }
 0x181   : > { %1101 = vst.msk [vmem:[#allocation2 + $0x14] sm:$0xf] %vm1095_vm15, %v1058_v40  ;;  %v1056_v22 = vpop.permute.xlu0 %1055  ;;  %1443 = vmatmul.msk.bf16.vlgmr.msra.gmra.mxu0 %vm1192_vm0, %v1454_v24  ;;  %v847_v0 = vpop.permute.xlu2 %846 }
 0x182   : > { %1100 = vst.msk [vmem:[#allocation2 + $0x10] sm:$0xf] %vm1095_vm15, %v1056_v22 }
 0x188   : > { %v774_v1 = vpop.permute.xlu1 %773 }
 0x189   : > { %808 = vst.msk [vmem:[#allocation2 + $0x38] sm:$0xf] %vm793_vm10, %v774_v1  ;;  %v768_v2 = vpop.permute.xlu0 %767  ;;  %v1456_v18 = vld [vmem:[#allocation2 + $0x10] sm:$0xff]  ;;  %v908_v6 = vpop.permute.xlu2 %907 }
 0x18a   : > { %805 = vst.msk [vmem:[#allocation2 + $0x2c] sm:$0xf] %vm793_vm10, %v768_v2  ;;  %1445 = vmatmul.msk.bf16.vlgmr.msra.gmra.mxu1 %vm1192_vm0, %v1456_v18 }
 0x18b   : > { %881 = vst.msk [vmem:[#allocation2 + $0x38] sm:$0xf] %vm866_vm11, %v847_v0 }
 0x190   : > { %v841_v59 = vpop.permute.xlu1 %840 }
 0x191   : > { %878 = vst.msk [vmem:[#allocation2 + $0x2c] sm:$0xf] %vm866_vm11, %v841_v59  ;;  %v839_v62 = vpop.permute.xlu0 %838  ;;  %v995_v3 = vpop.permute.xlu2 %994 }
 0x192   : > { %877 = vst.msk [vmem:[#allocation2 + $0x28] sm:$0xf] %vm866_vm11, %v839_v62 }
 0x193   : > { %945 = vst.msk [vmem:[#allocation2 + $0x2c] sm:$0xf] %vm933_vm13, %v908_v6 }
 0x198   : > { %v906_v57 = vpop.permute.xlu1 %905 }
 0x199   : > { %944 = vst.msk [vmem:[#allocation2 + $0x28] sm:$0xf] %vm933_vm13, %v906_v57  ;;  %v849_v14 = vpop.permute.xlu0 %848  ;;  %v1005_v46 = vpop.permute.xlu2 %1004 }
 0x19a   : > { %882 = vst.msk [vmem:[#allocation2 + $0x3c] sm:$0xf] %vm866_vm11, %v849_v14 }
 0x19b   : > { %1033 = vst.msk [vmem:[#allocation2 + $0x28] sm:$0xf] %vm1022_vm14, %v995_v3 }
 0x1a0   : > { %v916_v35 = vpop.permute.xlu1 %915 }
 0x1a1   : > { %949 = vst.msk [vmem:[#allocation2 + $0x3c] sm:$0xf] %vm933_vm13, %v916_v35  ;;  %v914_v33 = vpop.permute.xlu0 %913  ;;  %v1076_v17 = vpop.permute.xlu2 %1075 }
 0x1a2   : > { %948 = vst.msk [vmem:[#allocation2 + $0x38] sm:$0xf] %vm933_vm13, %v914_v33 }
 0x1a3   : > { %1038 = vst.msk [vmem:[#allocation2 + $0x3c] sm:$0xf] %vm1022_vm14, %v1005_v46 }
 0x1a8   : > { %v1003_v61 = vpop.permute.xlu1 %1002 }
 0x1a9   : > { %1037 = vst.msk [vmem:[#allocation2 + $0x38] sm:$0xf] %vm1022_vm14, %v1003_v61  ;;  %v997_v44 = vpop.permute.xlu0 %996  ;;  %v825_v38 = vpop.permute.xlu2 %824 }
 0x1aa   : > { %1034 = vst.msk [vmem:[#allocation2 + $0x2c] sm:$0xf] %vm1022_vm14, %v997_v44 }
 0x1ab   : > { %1110 = vst.msk [vmem:[#allocation2 + $0x38] sm:$0xf] %vm1095_vm15, %v1076_v17 }
 0x1ac   : > { %870 = vst.msk [vmem:[#allocation2 + $0xc] sm:$0xf] %vm866_vm11, %v825_v38 }
 0x1b0   : > { %v1070_v27 = vpop.permute.xlu1 %1069 }
 0x1b1   : > { %1107 = vst.msk [vmem:[#allocation2 + $0x2c] sm:$0xf] %vm1095_vm15, %v1070_v27  ;;  %v1068_v32 = vpop.permute.xlu0 %1067  ;;  %v890_v39 = vpop.permute.xlu2 %889 }
 0x1b2   : > { %1106 = vst.msk [vmem:[#allocation2 + $0x28] sm:$0xf] %vm1095_vm15, %v1068_v32 }
 0x1b8   : > { %v823_v8 = vpop.permute.xlu1 %822 }
 0x1b9   : > { %869 = vst.msk [vmem:[#allocation2 + $0x8] sm:$0xf] %vm866_vm11, %v823_v8  ;;  %v1078_v43 = vpop.permute.xlu0 %1077  ;;  %v1459_v29 = vld [vmem:[#allocation2 + $0x28] sm:$0xff]  ;;  %v900_v42 = vpop.permute.xlu2 %899 }
 0x1ba   : > { %1111 = vst.msk [vmem:[#allocation2 + $0x3c] sm:$0xf] %vm1095_vm15, %v1078_v43  ;;  %1448 = vmatmul.msk.bf16.gmra.mxu2 %vm1192_vm0, %v1459_v29 }
 0x1bb   : > { %936 = vst.msk [vmem:[#allocation2 + $0x8] sm:$0xf] %vm933_vm13, %v890_v39 }
 0x1c0   : > { %v833_v37 = vpop.permute.xlu1 %832 }
 0x1c1   : > { %874 = vst.msk [vmem:[#allocation2 + $0x1c] sm:$0xf] %vm866_vm11, %v833_v37  ;;  %v831_v23 = vpop.permute.xlu0 %830  ;;  %v1461_v56 = vld [vmem:[#allocation2 + $0x38] sm:$0xff]  ;;  %v987_v58 = vpop.permute.xlu2 %986 }
 0x1c2   : > { %873 = vst.msk [vmem:[#allocation2 + $0x18] sm:$0xf] %vm866_vm11, %v831_v23  ;;  %1450 = vmatmul.msk.bf16.gmra.mxu3 %vm1192_vm0, %v1461_v56 }
 0x1c3   : > { %941 = vst.msk [vmem:[#allocation2 + $0x1c] sm:$0xf] %vm933_vm13, %v900_v42 }
 0x1c8   : > { %v898_v20 = vpop.permute.xlu1 %897 }
 0x1c9   : > { %940 = vst.msk [vmem:[#allocation2 + $0x18] sm:$0xf] %vm933_vm13, %v898_v20  ;;  %v892_v41 = vpop.permute.xlu0 %891  ;;  %v1054_v19 = vpop.permute.xlu2 %1053 }
 0x1ca   : > { %937 = vst.msk [vmem:[#allocation2 + $0xc] sm:$0xf] %vm933_vm13, %v892_v41 }
 0x1cb   : > { %1029 = vst.msk [vmem:[#allocation2 + $0x18] sm:$0xf] %vm1022_vm14, %v987_v58 }
 0x1d0   : > { %v981_v25 = vpop.permute.xlu1 %980 }
 0x1d1   : > { %1026 = vst.msk [vmem:[#allocation2 + $0xc] sm:$0xf] %vm1022_vm14, %v981_v25  ;;  %v979_v34 = vpop.permute.xlu0 %978 }
 0x1d2   : > { %1025 = vst.msk [vmem:[#allocation2 + $0x8] sm:$0xf] %vm1022_vm14, %v979_v34 }
 0x1d3   : > { %1099 = vst.msk [vmem:[#allocation2 + $0xc] sm:$0xf] %vm1095_vm15, %v1054_v19 }
 0x1d8   : > { %v1052_v16 = vpop.permute.xlu1 %1051 }
 0x1d9   : > { %1098 = vst.msk [vmem:[#allocation2 + $0x8] sm:$0xf] %vm1095_vm15, %v1052_v16  ;;  %v989_v28 = vpop.permute.xlu0 %988 }
 0x1da   : > { %1030 = vst.msk [vmem:[#allocation2 + $0x1c] sm:$0xf] %vm1022_vm14, %v989_v28 }
 0x1dd   : > { %v1250_v26 = vpop.f32.mrf.mxu2 }
 0x1de   : > { %v1251_v53 = vadd.f32 %v2379_v51, %v1250_v26 }
 0x1e0   : > { %v1062_v7 = vpop.permute.xlu1 %1061  ;;  %v1455_v10 = vld [vmem:[#allocation2 + $0x8] sm:$0xff]  ;;  %v1278_v54 = vmax.f32 %v1251_v53, 0.0 }
 0x1e1   : > { %1103 = vst.msk [vmem:[#allocation2 + $0x1c] sm:$0xf] %vm1095_vm15, %v1062_v7  ;;  %v1060_v5 = vpop.permute.xlu0 %1059  ;;  %1444 = vmatmul.msk.bf16.gmra.mxu0 %vm1192_vm0, %v1455_v10 }
 0x1e2   : > { %1102 = vst.msk [vmem:[#allocation2 + $0x18] sm:$0xf] %vm1095_vm15, %v1060_v5 }
 0x1e3   : > { %1295 = vst.msk [vmem:[%s2385_s26 + $0x40] sm:$0xff] %vm1286_vm1, %v1278_v54 }
 0x1e5   : > { %v1252_v4 = vpop.f32.mrf.mxu2  ;;  %v1260_v49 = vpop.f32.mrf.mxu3 }
 0x1e6   : > { %v1253_v9 = vadd.f32 %v2379_v51, %v1252_v4  ;;  %v1261_v12 = vadd.f32 %v2379_v51, %v1260_v49 }
 0x1e8   : > { %v1279_v55 = vmax.f32 %v1253_v9, 0.0  ;;  %v1282_v36 = vmax.f32 %v1261_v12, 0.0 }
 0x1e9   : > { %v1457_v21 = vld [vmem:[#allocation2 + $0x18] sm:$0xff] }
 0x1ea   : > { %1296 = vst.msk [vmem:[%s2385_s26 + $0x48] sm:$0xff] %vm1286_vm1, %v1279_v55  ;;  %1446 = vmatmul.msk.bf16.gmra.mxu1 %vm1192_vm0, %v1457_v21 }
 0x1eb   : > { %1299 = vst.msk [vmem:[%s2385_s26 + $0x60] sm:$0xff] %vm1286_vm1, %v1282_v36 }
 0x1ed   : > { %v1262_v47 = vpop.f32.mrf.mxu3 }
 0x1ee   : > { %v1263_v63 = vadd.f32 %v2379_v51, %v1262_v47 }
 0x1f0   : > { %v1283_v31 = vmax.f32 %v1263_v63, 0.0 }
 0x1f2   : > { %1300 = vst.msk [vmem:[%s2385_s26 + $0x68] sm:$0xff] %vm1286_vm1, %v1283_v31 }
 0x1fe   : > { %v1230_v30 = vpop.f32.mrf.mxu0 }
 0x1ff   : > { %v1231_v48 = vadd.f32 %v2379_v51, %v1230_v30 }
 0x201   : > { %v1270_v15 = vmax.f32 %v1231_v48, 0.0 }
 0x203   : > { %1287 = vst.msk [vmem:[%s2385_s26] sm:$0xff] %vm1286_vm1, %v1270_v15 }
 0x206   : > { %v1232_v52 = vpop.f32.mrf.mxu0 }
 0x207   : > { %v1233_v60 = vadd.f32 %v2379_v51, %v1232_v52  ;;  %v1240_v13 = vpop.f32.mrf.mxu1 }
 0x208   : > { %v1241_v50 = vadd.f32 %v2379_v51, %v1240_v13 }
 0x209   : > { %v1271_v45 = vmax.f32 %v1233_v60, 0.0 }
 0x20a   : > { %v1274_v11 = vmax.f32 %v1241_v50, 0.0 }
 0x20b   : > { %1288 = vst.msk [vmem:[%s2385_s26 + $0x8] sm:$0xff] %vm1286_vm1, %v1271_v45 }
 0x20c   : > { %1291 = vst.msk [vmem:[%s2385_s26 + $0x20] sm:$0xff] %vm1286_vm1, %v1274_v11 }
 0x20f   : > { %v1242_v40 = vpop.f32.mrf.mxu1 }
 0x210   : > { %v1243_v24 = vadd.f32 %v2379_v51, %v1242_v40 }
 0x212   : > { %v1275_v22 = vmax.f32 %v1243_v24, 0.0 }
 0x214   : > { %1292 = vst.msk [vmem:[%s2385_s26 + $0x28] sm:$0xff] %vm1286_vm1, %v1275_v22 }
 0x23d   : > { %v1255_v0 = vpop.f32.mrf.mxu2 }
 0x23e   : > { %v1256_v1 = vadd.f32 %v2379_v51, %v1255_v0 }
 0x240   : > { %v1280_v2 = vmax.f32 %v1256_v1, 0.0 }
 0x242   : > { %1297 = vst.msk [vmem:[%s2385_s26 + $0x50] sm:$0xff] %vm1286_vm1, %v1280_v2 }
 0x245   : > { %v1257_v18 = vpop.f32.mrf.mxu2  ;;  %v1265_v6 = vpop.f32.mrf.mxu3 }
 0x246   : > { %v1258_v59 = vadd.f32 %v2379_v51, %v1257_v18  ;;  %v1266_v62 = vadd.f32 %v2379_v51, %v1265_v6 }
 0x248   : > { %v1281_v3 = vmax.f32 %v1258_v59, 0.0  ;;  %v1284_v57 = vmax.f32 %v1266_v62, 0.0 }
 0x24a   : > { %1298 = vst.msk [vmem:[%s2385_s26 + $0x58] sm:$0xff] %vm1286_vm1, %v1281_v3 }
 0x24b   : > { %1301 = vst.msk [vmem:[%s2385_s26 + $0x70] sm:$0xff] %vm1286_vm1, %v1284_v57 }
 0x24d   : > { %v1267_v14 = vpop.f32.mrf.mxu3 }
 0x24e   : > { %v1268_v46 = vadd.f32 %v2379_v51, %v1267_v14 }
 0x250   : > { %v1285_v35 = vmax.f32 %v1268_v46, 0.0 }
 0x252   : > { %1302 = vst.msk [vmem:[%s2385_s26 + $0x78] sm:$0xff] %vm1286_vm1, %v1285_v35 }
 0x25e   : > { %v1235_v33 = vpop.f32.mrf.mxu0 }
 0x25f   : > { %v1236_v17 = vadd.f32 %v2379_v51, %v1235_v33 }
 0x261   : > { %v1272_v61 = vmax.f32 %v1236_v17, 0.0 }
 0x263   : > { %1289 = vst.msk [vmem:[%s2385_s26 + $0x10] sm:$0xff] %vm1286_vm1, %v1272_v61 }
 0x266   : > { %v1237_v44 = vpop.f32.mrf.mxu0 }
 0x267   : > { %v1238_v38 = vadd.f32 %v2379_v51, %v1237_v44  ;;  %v1245_v27 = vpop.f32.mrf.mxu1 }
 0x268   : > { %v1246_v32 = vadd.f32 %v2379_v51, %v1245_v27 }
 0x269   : > { %v1273_v39 = vmax.f32 %v1238_v38, 0.0 }
 0x26a   : > { %v1276_v8 = vmax.f32 %v1246_v32, 0.0 }
 0x26b   : > { %1290 = vst.msk [vmem:[%s2385_s26 + $0x18] sm:$0xff] %vm1286_vm1, %v1273_v39 }
 0x26c   : > { %1293 = vst.msk [vmem:[%s2385_s26 + $0x30] sm:$0xff] %vm1286_vm1, %v1276_v8 }
 0x26f   : > { %v1247_v43 = vpop.f32.mrf.mxu1 }
 0x270   : > { %v1248_v29 = vadd.f32 %v2379_v51, %v1247_v43 }
 0x272   : > { %v1277_v42 = vmax.f32 %v1248_v29, 0.0 }
 0x274   : > { %1294 = vst.msk [vmem:[%s2385_s26 + $0x38] sm:$0xff] %vm1286_vm1, %v1277_v42 }
 0x275 PF: > { %s13_s16 = sadd.s32 1, %s1561_s16   ;;  %s2461_s12 = smov %s1553_s14 }
 0x276   : > { %p10_p7 = scmp.ge.s32.totalorder %s13_s16, 6   ;;  %s2462_s13 = smov %s1557_s15 }
 0x277   : > { %s2463_s14 = smov %s2466_s17  ;;  %s2464_s15 = smov %s2470_s18 }
 0x278   :  { %12 = sbr.rel (!%p10_p7) target bundleno = 3 (0x3), region = 63 }

</bundles_post_ra>
